<compile_context>
chip_gen: v7x
topology: tpu7x:2x2x1
jax: 0.10.0
libtpu: 0.0.40
codegen_flags: <defaults>
</compile_context>

<pallas_src>
import jax
import jax.numpy as jnp
from jax.experimental import pallas as pl
from jax.experimental.pallas import tpu as pltpu


def _gelu_tanh(h):
    # TODO(synk): nn.GELU() default is the exact erf form; the tanh
    # approximation (abs diff < 3e-3) is used so it lowers to the EUP tanh op.
    c = jnp.sqrt(2.0 / jnp.pi).astype(h.dtype)
    return 0.5 * h * (1.0 + jnp.tanh(c * (h + 0.044715 * h * h * h)))


def _ffn_kernel(x_ref, w1_ref, b1_ref, w2_ref, b2_ref, o_ref):
    # x tile: (TR, C) f32 | w1: (C, H) bf16 | b1: (1, H) f32
    # w2: (H, C) bf16     | b2: (1, C) f32  | out tile: (TR, C)
    x = x_ref[...]
    h = jnp.dot(x.astype(jnp.bfloat16), w1_ref[...],
                preferred_element_type=jnp.float32) + b1_ref[...]
    h = _gelu_tanh(h)                                    # f32 elementwise
    y = jnp.dot(h.astype(jnp.bfloat16), w2_ref[...],
                preferred_element_type=jnp.float32) + b2_ref[...]
    o_ref[...] = y.astype(o_ref.dtype)


def feed_forward(x, w1, b1, w2, b2, *, row_tile=128):
    """y = GELU(x @ w1 + b1) @ w2 + b2   (dropout = 0 -> identity)."""
    orig_shape = x.shape
    C = orig_shape[-1]
    Hd = w1.shape[-1]

    x2d = x.reshape(-1, C)                 # fold batch/seq into a row axis
    R = x2d.shape[0]

    # Pick a sublane-friendly row tile and zero-pad R up to a multiple of it.
    if R >= row_tile:
        tr = row_tile
    else:
        tr = ((R + 7) // 8) * 8            # keep second-minor dim %8 == 0
    pad = (-R) % tr
    if pad:
        x2d = jnp.pad(x2d, ((0, pad), (0, 0)))
    Rp = R + pad

    # bf16 MXU operands (cast once; halves weight DMA + VMEM residency).
    w1b = w1.astype(jnp.bfloat16)
    w2b = w2.astype(jnp.bfloat16)
    b1f = b1.reshape(1, Hd).astype(jnp.float32)
    b2f = b2.reshape(1, C).astype(jnp.float32)

    # Grid-invariant params: whole array resident in VMEM, single-buffered.
    vmem_whole = pl.BlockSpec(memory_space=pltpu.MemorySpace.VMEM)

    out2d = pl.pallas_call(
        _ffn_kernel,
        out_shape=jax.ShapeDtypeStruct((Rp, C), x.dtype),
        grid=(Rp // tr,),
        in_specs=[
            pl.BlockSpec((tr, C), lambda i: (i, 0)),    # x rows (pipelined)
            vmem_whole,                                 # w1
            vmem_whole,                                 # b1
            vmem_whole,                                 # w2
            vmem_whole,                                 # b2
        ],
        out_specs=pl.BlockSpec((tr, C), lambda i: (i, 0)),
        compiler_params=pltpu.CompilerParams(
            dimension_semantics=("parallel",),          # shard rows across TCs
            vmem_limit_bytes=64 * 1024 * 1024,
        ),
    )(x2d, w1b, b1f, w2b, b2f)

    if pad:
        out2d = out2d[:R]
    return out2d.reshape(orig_shape)


# ---------------------------------------------------------------------------
# pure-JAX reference (same bf16-matmul / f32-accumulate numerics)
# ---------------------------------------------------------------------------
def _reference(x, w1, b1, w2, b2):
    C = x.shape[-1]
    x2d = x.reshape(-1, C)
    h = jnp.dot(x2d.astype(jnp.bfloat16), w1.astype(jnp.bfloat16),
                preferred_element_type=jnp.float32) + b1.reshape(1, -1)
    h = _gelu_tanh(h)
    y = jnp.dot(h.astype(jnp.bfloat16), w2.astype(jnp.bfloat16),
                preferred_element_type=jnp.float32) + b2.reshape(1, -1)
    return y.reshape(x.shape).astype(x.dtype)


if __name__ == "__main__":
    B, N, C = 2, 128, 128          # dim = 128
    Hd = 4 * C                     # hidden_dim = 512

    key = jax.random.PRNGKey(0)
    kx, k1, k2, k3, k4 = jax.random.split(key, 5)
    x = jax.random.normal(kx, (B, N, C), jnp.float32)
    w1 = jax.random.normal(k1, (C, Hd), jnp.float32) * 0.05
    b1 = jax.random.normal(k2, (Hd,), jnp.float32) * 0.05
    w2 = jax.random.normal(k3, (Hd, C), jnp.float32) * 0.05
    b2 = jax.random.normal(k4, (C,), jnp.float32) * 0.05

    out = feed_forward(x, w1, b1, w2, b2)
    out = jax.block_until_ready(out)

    ref = _reference(x, w1, b1, w2, b2)
    assert out.shape == (B, N, C)
    assert jnp.allclose(out, ref, atol=1e-2, rtol=1e-2), "kernel/reference mismatch"
    print("KERNEL_OK")
</pallas_src>

<mosaic_0001>
module attributes {stable_mosaic.version = 11 : i64} {
  func.func @_ffn_kernel(%arg0: i32, %arg1: memref<128x128xf32, #tpu.memory_space<vmem>>, %arg2: memref<128x512xbf16, #tpu.memory_space<vmem>>, %arg3: memref<1x512xf32, #tpu.memory_space<vmem>>, %arg4: memref<512x128xbf16, #tpu.memory_space<vmem>>, %arg5: memref<1x128xf32, #tpu.memory_space<vmem>>, %arg6: memref<128x128xf32, #tpu.memory_space<vmem>>) attributes {dimension_semantics = [#tpu.dimension_semantics<parallel>], iteration_bounds = array<i64: 2>, scalar_prefetch = 0 : i64, scratch_operands = 0 : i64, tpu.core_type = #tpu.core_type<tc>, window_params = [{transform_indices = @transform_0, window_bounds = array<i64: 128, 128>}, {pipeline_mode = #tpu.pipeline_mode<synchronous>, transform_indices = @transform_1, window_bounds = array<i64: 128, 512>}, {pipeline_mode = #tpu.pipeline_mode<synchronous>, transform_indices = @transform_2, window_bounds = array<i64: 1, 512>}, {pipeline_mode = #tpu.pipeline_mode<synchronous>, transform_indices = @transform_3, window_bounds = array<i64: 512, 128>}, {pipeline_mode = #tpu.pipeline_mode<synchronous>, transform_indices = @transform_4, window_bounds = array<i64: 1, 128>}, {transform_indices = @transform_5, window_bounds = array<i64: 128, 128>}]} {
    %c0 = arith.constant 0 : index
    %c0_0 = arith.constant 0 : index
    %0 = vector.load %arg1[%c0, %c0_0] : memref<128x128xf32, #tpu.memory_space<vmem>>, vector<128x128xf32>
    %1 = arith.truncf %0 : vector<128x128xf32> to vector<128x128xbf16>
    %c0_1 = arith.constant 0 : index
    %c0_2 = arith.constant 0 : index
    %2 = vector.load %arg2[%c0_1, %c0_2] : memref<128x512xbf16, #tpu.memory_space<vmem>>, vector<128x512xbf16>
    %cst = arith.constant dense<0.000000e+00> : vector<128x512xf32>
    %3 = tpu.matmul %1, %2, %cst {dimension_numbers = #tpu.dot_dimension_numbers<[1], [0], [0], [1], [0, 0, 1, 1], [], []>} : vector<128x128xbf16>, vector<128x512xbf16>, vector<128x512xf32> -> vector<128x512xf32>
    %c0_3 = arith.constant 0 : index
    %c0_4 = arith.constant 0 : index
    %4 = vector.load %arg3[%c0_3, %c0_4] : memref<1x512xf32, #tpu.memory_space<vmem>>, vector<1x512xf32>
    %5 = vector.broadcast %4 : vector<1x512xf32> to vector<128x512xf32>
    %6 = arith.addf %3, %5 : vector<128x512xf32>
    %cst_5 = arith.constant 0.636619746 : f32
    %7 = math.sqrt %cst_5 : f32
    %cst_6 = arith.constant 5.000000e-01 : f32
    %8 = vector.broadcast %cst_6 : f32 to vector<128x512xf32>
    %9 = arith.mulf %8, %6 : vector<128x512xf32>
    %cst_7 = arith.constant 4.471500e-02 : f32
    %10 = vector.broadcast %cst_7 : f32 to vector<128x512xf32>
    %11 = arith.mulf %10, %6 : vector<128x512xf32>
    %12 = arith.mulf %11, %6 : vector<128x512xf32>
    %13 = arith.mulf %12, %6 : vector<128x512xf32>
    %14 = arith.addf %6, %13 : vector<128x512xf32>
    %15 = vector.broadcast %7 : f32 to vector<128x512xf32>
    %16 = arith.mulf %15, %14 : vector<128x512xf32>
    %17 = math.tanh %16 : vector<128x512xf32>
    %cst_8 = arith.constant 1.000000e+00 : f32
    %18 = vector.broadcast %cst_8 : f32 to vector<128x512xf32>
    %19 = arith.addf %18, %17 : vector<128x512xf32>
    %20 = arith.mulf %9, %19 : vector<128x512xf32>
    %21 = arith.truncf %20 : vector<128x512xf32> to vector<128x512xbf16>
    %c0_9 = arith.constant 0 : index
    %c0_10 = arith.constant 0 : index
    %22 = vector.load %arg4[%c0_9, %c0_10] : memref<512x128xbf16, #tpu.memory_space<vmem>>, vector<512x128xbf16>
    %cst_11 = arith.constant dense<0.000000e+00> : vector<128x128xf32>
    %23 = tpu.matmul %21, %22, %cst_11 {dimension_numbers = #tpu.dot_dimension_numbers<[1], [0], [0], [1], [0, 0, 1, 1], [], []>} : vector<128x512xbf16>, vector<512x128xbf16>, vector<128x128xf32> -> vector<128x128xf32>
    %c0_12 = arith.constant 0 : index
    %c0_13 = arith.constant 0 : index
    %24 = vector.load %arg5[%c0_12, %c0_13] : memref<1x128xf32, #tpu.memory_space<vmem>>, vector<1x128xf32>
    %25 = vector.broadcast %24 : vector<1x128xf32> to vector<128x128xf32>
    %26 = arith.addf %23, %25 : vector<128x128xf32>
    %c0_14 = arith.constant 0 : index
    %c0_15 = arith.constant 0 : index
    %27 = vector.load %arg6[%c0_14, %c0_15] : memref<128x128xf32, #tpu.memory_space<vmem>>, vector<128x128xf32>
    tpu.vector_store %arg6[%c0_14, %c0_15], %26 {strides = array<i32>} : memref<128x128xf32, #tpu.memory_space<vmem>>, vector<128x128xf32>,
    return
  }
  func.func @transform_0(%arg0: i32) -> (i32, i32) {
    %c0_i32 = arith.constant 0 : i32
    %c0_i32_0 = arith.constant 0 : i32
    return %arg0, %c0_i32 : i32, i32
  }
  func.func @transform_1(%arg0: i32) -> (i32, i32) {
    %c0_i32 = arith.constant 0 : i32
    %c0_i32_0 = arith.constant 0 : i32
    %c0_i32_1 = arith.constant 0 : i32
    return %c0_i32, %c0_i32_0 : i32, i32
  }
  func.func @transform_2(%arg0: i32) -> (i32, i32) {
    %c0_i32 = arith.constant 0 : i32
    %c0_i32_0 = arith.constant 0 : i32
    %c0_i32_1 = arith.constant 0 : i32
    return %c0_i32, %c0_i32_0 : i32, i32
  }
  func.func @transform_3(%arg0: i32) -> (i32, i32) {
    %c0_i32 = arith.constant 0 : i32
    %c0_i32_0 = arith.constant 0 : i32
    %c0_i32_1 = arith.constant 0 : i32
    return %c0_i32, %c0_i32_0 : i32, i32
  }
  func.func @transform_4(%arg0: i32) -> (i32, i32) {
    %c0_i32 = arith.constant 0 : i32
    %c0_i32_0 = arith.constant 0 : i32
    %c0_i32_1 = arith.constant 0 : i32
    return %c0_i32, %c0_i32_0 : i32, i32
  }
  func.func @transform_5(%arg0: i32) -> (i32, i32) {
    %c0_i32 = arith.constant 0 : i32
    %c0_i32_0 = arith.constant 0 : i32
    return %arg0, %c0_i32 : i32, i32
  }
}

</mosaic_0001>

<bundles_post_ra>
// kernel: tpu_custom_call.1
= control target key start
LH: loop header
LB: loop body
LE: loop exit
PB: predicated region body
PF: predicated region fallthrough
CT: control target
= control target key end

     0   :  { %10 = vsyncpa [#allocation3], 0  ;;  %s3909_s0 = inlined_call_operand.hbm [shape: f32[256,128], index: 0, kind: input, shape index: {}]   ;;  %s3910_s1 = inlined_call_operand.hbm [shape: bf16[128,512], index: 1, kind: input, shape index: {}]   ;;  %s3911_s2 = inlined_call_operand.hbm [shape: f32[1,512], index: 2, kind: input, shape index: {}]   ;;  %s3912_s3 = inlined_call_operand.hbm [shape: bf16[512,128], index: 3, kind: input, shape index: {}]   ;;  %s3913_s4 = inlined_call_operand.hbm [shape: f32[1,128], index: 4, kind: input, shape index: {}]   ;;  %s3914_s5 = inlined_call_operand.hbm [shape: f32[256,128], index: 5, kind: output, shape index: {}]  }
   0x1   :  { %12 = vsyncpa [#allocation3 + $0x1], 0 }
   0x2   :  { %13 = vsyncpa [#allocation6], 0 }
   0x3   :  { %14 = vsyncpa [#allocation9], 0 }
   0x4   :  { %15 = vsyncpa [#allocation4], 0 }
   0x5   :  { %17 = vsyncpa [#allocation4 + $0x1], 0  ;;  %s2754_s18 = smov 0   ;;  %s2756_s19 = smov 0  }
   0x6   :  { %s2758_s20 = smov 0   ;;  %s2760_s21 = smov 0  }
   0x7 LB: > { %s2775_s22 = sadd.s32 4294967295, %s2707_s21   ;;  %s1970_s23 = sadd.s32 4294967294, %s2707_s21   ;;  %s2707_s21 = sphi %s2760_s21, %s4143_s21   ;;  %s2703_s20 = sphi %s2758_s20, %s4142_s20   ;;  %s2699_s19 = sphi %s2756_s19, %s4141_s19   ;;  %s2695_s18 = sphi %s2754_s18, %s4140_s18  }
   0x8   : > { %p43_p0 = scmp.ne.s32.totalorder %s2699_s19, %s2695_s18  ;;  %p3915_p1 = scmp.eq.s32.totalorder %s2775_s22, 0 }
   0x9   : > { %p157_p3 = scmp.eq.s32.totalorder %s1970_s23, 1  ;;  %p1971_p5 = scmp.ge.s32.totalorder %s2707_s21, 1 }
   0xa   : > { %p2784_p4 = por %p3915_p1, %p43_p0  ;;  %p164_p7 = scmp.lt.s32.totalorder %s2707_s21, 3 }
   0xb   : > { %p2789_p6 = por %p157_p3, %p43_p0  ;;  %s2709_s27 = smov [#allocation5]  }
   0xc   : > { %s3980_s24 = scalar_select %p2784_p4, 1, 0 }
   0xd   : > { %s3981_s25 = scalar_select %p2789_p6, 1, 0 }
   0xe   : > { %p2794_p8 = pnand %p1971_p5, %p164_p7  ;;  %s176_s28 = sshll.u32 %s2709_s27, 4  ;;  %s2798_s28 = int_to_ptr.vmem [resolvable:$true] %s176_s28 }
   0xf   : > { %s2710_s30 = smov [#allocation8]   ;;  %s2491_s9 = scalar_lea.hbm %s3910_s1, 4096 }
  0x10   : > { %s3982_s26 = scalar_select %p2794_p8, 1, 0 }
  0x11   : > { %p2207_p9 = pneg %p2794_p8  ;;  %s200_s6 = sshll.u32 %s2710_s30, 4  ;;  %s2809_s6 = int_to_ptr.vmem [resolvable:$true] %s200_s6 }
  0x12   : > { %p2492_p12 = scmp.ne.s32.totalorder %s3910_s1, %s2491_s9  ;;  %p2498_p5 = scmp.lt.u32.totalorder %s2491_s9, %s3910_s1 }
  0x13   : > { %p2805_p11 = pnand %p2207_p9, %p3915_p1 }
  0x15   : > { %p2819_p13 = pneg %p2805_p11 }
  0x17   : > { %p2494_p0 = pnand %p2819_p13, %p2492_p12 }
  0x19   : > { %p2495_p3 = pneg %p2494_p0 }
  0x1b   : > { %p2500_p7 = pnand %p2498_p5, %p2495_p3 }
  0x1d   : > { %2503 = shalt.err (!%p2500_p7)
}
  0x1e   : > { %s2504_s15 = scalar_lea.vmem %s2798_s28, 4096  ;;  %p2512_p2 = scmp.lt.s32.totalorder %s2798_s28, %s2798_s28 }
  0x1f   : > { %p2505_p9 = scmp.ne.s32.totalorder %s2798_s28, %s2504_s15  ;;  %p2513_p6 = scmp.lt.s32.totalorder %s2504_s15, %s2504_s15 }
  0x21   : > { %p2507_p10 = pnand %p2505_p9, %p2819_p13  ;;  %p2514_p12 = por %p2513_p6, %p2512_p2 }
  0x23   : > { %p2508_p1 = pneg %p2507_p10 }
  0x25   : > { %p2515_p0 = pnand %p2514_p12, %p2508_p1 }
  0x27   : > { %2518 = shalt.err (!%p2515_p0)
}
  0x28   : > { %s2711_s16 = smov 256   ;;  %s2712_s17 = smov 16  }
  0x29   : > { %2210 = dma.hbm_to_vmem [thread:$0]  (!%p2805_p11), %s3910_s1, 4096, %s2798_s28, [#allocation6], %s2711_s16, %s2711_s16, %s2712_s17  }
  0x2a   : > { %s2519_s8 = scalar_lea.hbm %s3912_s3, 4096 }
  0x2b   : > { %p2520_p2 = scmp.ne.s32.totalorder %s3912_s3, %s2519_s8  ;;  %p2526_p10 = scmp.lt.u32.totalorder %s2519_s8, %s3912_s3 }
  0x2d   : > { %p2522_p1 = pnand %p2520_p2, %p2819_p13 }
  0x2f   : > { %p2523_p6 = pneg %p2522_p1 }
  0x31   : > { %p2528_p3 = pnand %p2526_p10, %p2523_p6 }
  0x33   : > { %2531 = shalt.err (!%p2528_p3)
}
  0x34   : > { %s2532_s28 = scalar_lea.vmem %s2809_s6, 4096  ;;  %p2540_p12 = scmp.lt.s32.totalorder %s2809_s6, %s2809_s6 }
  0x35   : > { %p2533_p5 = scmp.ne.s32.totalorder %s2809_s6, %s2532_s28  ;;  %p2541_p0 = scmp.lt.s32.totalorder %s2532_s28, %s2532_s28 }
  0x37   : > { %p2535_p7 = pnand %p2533_p5, %p2819_p13  ;;  %p2542_p2 = por %p2541_p0, %p2540_p12 }
  0x39   : > { %p2536_p9 = pneg %p2535_p7 }
  0x3b   : > { %p2543_p1 = pnand %p2542_p2, %p2536_p9 }
  0x3d   : > { %2546 = shalt.err (!%p2543_p1)
}
  0x3e   : > { %s2713_s14 = smov 64   ;;  %s2714_s15 = smov 4  }
  0x3f   : > { %2216 = dma.hbm_to_vmem [thread:$0]  (!%p2805_p11), %s3912_s3, 4096, %s2809_s6, [#allocation9], %s2713_s14, %s2713_s14, %s2714_s15  }
  0x40   : > { %s2715_s23 = smov [#allocation7]   ;;  %s2716_s30 = smov [#allocation10]  }
  0x41   : > { %s190_s27 = sshll.u32 %s2715_s23, 4  ;;  %s214_s7 = sshll.u32 %s2716_s30, 4  ;;  %s191_s27 = int_to_ptr.vmem [resolvable:$true] %s190_s27  ;;  %s2863_s7 = int_to_ptr.vmem [resolvable:$true] %s214_s7 }
  0x42   : > { %s2547_s10 = scalar_lea.hbm %s3911_s2, 64 }
  0x43   : > { %p2548_p6 = scmp.ne.s32.totalorder %s3911_s2, %s2547_s10  ;;  %p2554_p5 = scmp.lt.u32.totalorder %s2547_s10, %s3911_s2 }
  0x45   : > { %p2550_p10 = pnand %p2548_p6, %p2819_p13 }
  0x47   : > { %p2551_p3 = pneg %p2550_p10 }
  0x49   : > { %p2556_p7 = pnand %p2554_p5, %p2551_p3 }
  0x4b   : > { %2559 = shalt.err (!%p2556_p7)
}
  0x4c   : > { %s2560_s14 = scalar_lea.vmem %s191_s27, 64  ;;  %p2568_p2 = scmp.lt.s32.totalorder %s191_s27, %s191_s27 }
  0x4d   : > { %p2561_p9 = scmp.ne.s32.totalorder %s191_s27, %s2560_s14  ;;  %p2569_p1 = scmp.lt.s32.totalorder %s2560_s14, %s2560_s14 }
  0x4f   : > { %p2563_p12 = pnand %p2561_p9, %p2819_p13  ;;  %p2570_p4 = por %p2569_p1, %p2568_p2 }
  0x51   : > { %p2564_p0 = pneg %p2563_p12 }
  0x53   : > { %p2571_p8 = pnand %p2570_p4, %p2564_p0 }
  0x55   : > { %2574 = shalt.err (!%p2571_p8)
}
  0x56   : > { %2213 = dma.hbm_to_vmem [thread:$0]  (!%p2805_p11), %s3911_s2, 64, %s191_s27, [#allocation6]  }
  0x57   : > { %s2575_s30 = scalar_lea.hbm %s3913_s4, 16 }
  0x58   : > { %p2576_p6 = scmp.ne.s32.totalorder %s3913_s4, %s2575_s30  ;;  %p2582_p4 = scmp.lt.u32.totalorder %s2575_s30, %s3913_s4 }
  0x5a   : > { %p2578_p10 = pnand %p2576_p6, %p2819_p13 }
  0x5c   : > { %p2579_p3 = pneg %p2578_p10 }
  0x5e   : > { %p2584_p8 = pnand %p2582_p4, %p2579_p3 }
  0x60   : > { %2587 = shalt.err (!%p2584_p8)
}
  0x61   : > { %s2588_s27 = scalar_lea.vmem %s2863_s7, 16  ;;  %s2595_s13 = scalar_lea.vmem %s2863_s7, 32 }
  0x62   : > { %p2589_p5 = scmp.ne.s32.totalorder %s2863_s7, %s2588_s27  ;;  %p2596_p12 = scmp.lt.s32.totalorder %s2863_s7, %s2863_s7 }
  0x63   : > { %p2597_p0 = scmp.lt.s32.totalorder %s2595_s13, %s2588_s27 }
  0x64   : > { %p2591_p7 = pnand %p2589_p5, %p2819_p13 }
  0x65   : > { %p2598_p2 = por %p2597_p0, %p2596_p12 }
  0x66   : > { %p2592_p9 = pneg %p2591_p7 }
  0x68   : > { %p2599_p1 = pnand %p2598_p2, %p2592_p9 }
  0x6a   : > { %2602 = shalt.err (!%p2599_p1)
}
  0x6b   : > { %2219 = dma.hbm_to_vmem [thread:$0]  (!%p2805_p11), %s3913_s4, 16, %s2863_s7, [#allocation9]  }
  0x6c   : > { %s2908_s12 = sadd.s32 1, %s2707_s21   ;;  %s30_s14 = sadd.s32 1, %s2703_s20 }
  0x6d   : > { %s27_s29 = ssub.s32 %s2707_s21, %s2908_s12  ;;  %p37_p6 = scmp.ne.s32.totalorder %s2703_s20, %s2699_s19 }
  0x6e   : > { %p28_p13 = scmp.eq.s32.totalorder %s27_s29, 0  ;;  %p38_p10 = scmp.eq.s32.totalorder %s2707_s21, 0 }
  0x6f   : > { %p3985_p4 = scmp.eq.s32.totalorder %s2775_s22, 1  ;;  %p2232_p5 = scmp.lt.s32.totalorder %s2707_s21, 2 }
  0x70   : > { %s2917_s15 = scalar_select %p28_p13, %s2703_s20, %s30_s14  }
  0x71   : > { %p39_p3 = por %p38_p10, %p37_p6  ;;  %p2921_p8 = por %p3985_p4, %p37_p6 }
  0x72   : > { %s225_s17 = sand.u32 1, %s2703_s20   ;;  %s2057_s7 = sshll.u32 %s2707_s21, 11 }
  0x73   : > { %s1977_s23 = sshll.u32 %s225_s17, 7  ;;  %s2931_s9 = scalar_lea.hbm %s3909_s0, %s2057_s7 }
  0x74   : > { %s229_s10 = scalar_lea.vmem [#allocation2], %s1977_s23  ;;  %p2935_p11 = pnand %p2232_p5, %p39_p3 }
  0x75   : > { %s236_s11 = sshll.u32 %s229_s10, 4  ;;  %s2939_s13 = scalar_lea.sflag [#allocation3], %s225_s17  ;;  %s2933_s11 = int_to_ptr.vmem [resolvable:$true] %s236_s11 }
  0x76   : > { %s2603_s28 = scalar_lea.hbm %s2931_s9, 2048  ;;  %p2605_p9 = pneg %p2935_p11 }
  0x77   : > { %p2604_p7 = scmp.ne.s32.totalorder %s2931_s9, %s2603_s28  ;;  %s2608_s14 = scalar_lea.hbm %s3909_s0, 4096 }
  0x78   : > { %p2609_p2 = scmp.lt.u32.totalorder %s2931_s9, %s3909_s0  ;;  %p2610_p1 = scmp.lt.u32.totalorder %s2608_s14, %s2603_s28 }
  0x79   : > { %p2606_p12 = pnand %p2605_p9, %p2604_p7  ;;  %p2612_p6 = scmp.lt.u32.totalorder %s2603_s28, %s2931_s9 }
  0x7a   : > { %p2611_p13 = por %p2610_p1, %p2609_p2 }
  0x7b   : > { %p2607_p0 = pneg %p2606_p12 }
  0x7c   : > { %p2613_p10 = por %p2612_p6, %p2611_p13 }
  0x7e   : > { %p2614_p3 = pnand %p2613_p10, %p2607_p0 }
  0x80   : > { %2617 = shalt.err (!%p2614_p3)
}
  0x81   : > { %s2618_s17 = scalar_lea.vmem %s2933_s11, 2048  ;;  %s2717_s30 = smov [#allocation2]  }
  0x82   : > { %p2619_p4 = scmp.ne.s32.totalorder %s2933_s11, %s2618_s17  ;;  %s2623_s8 = sshll.u32 %s2717_s30, 4  ;;  %s2624_s8 = int_to_ptr.vmem [resolvable:$false] %s2623_s8 }
  0x83   : > { %s2625_s10 = scalar_lea.vmem %s2624_s8, 4096  ;;  %p2626_p12 = scmp.lt.s32.totalorder %s2933_s11, %s2624_s8 }
  0x84   : > { %p2621_p5 = pnand %p2619_p4, %p2605_p9  ;;  %p2627_p2 = scmp.lt.s32.totalorder %s2625_s10, %s2618_s17 }
  0x86   : > { %p2622_p7 = pneg %p2621_p5  ;;  %p2628_p1 = por %p2627_p2, %p2626_p12 }
  0x88   : > { %p2629_p13 = pnand %p2628_p1, %p2622_p7 }
  0x8a   : > { %2632 = shalt.err (!%p2629_p13)
}
  0x8b   : > { %s2718_s28 = smov 128   ;;  %s2719_s6 = smov 8  }
  0x8c   : > { %2223 = dma.hbm_to_vmem [thread:$0]  (!%p2935_p11), %s2931_s9, 2048, %s2933_s11, %s2939_s13, %s2718_s28, %s2718_s28, %s2719_s6  }
  0x8d   : > { %p3988_p9 = scmp.ne.s32.totalorder %s3982_s26, 0 }
  0x8f   : > { %248 = sbr.rel (%p3988_p9) target bundleno = 821 (0x335), region = 40 }
  0x96   : > { %s2970_s29 = sand.u32 1, %s2699_s19   ;;  %p3989_p0 = scmp.ne.s32.totalorder %s3980_s24, 0 }
  0x97   : > { %s1981_s14 = sshll.u32 %s2970_s29, 7  ;;  %s251_s23 = scalar_lea.sflag [#allocation3], %s2970_s29 }
  0x98   : > { %s2976_s7 = scalar_lea.vmem [#allocation2], %s1981_s14 }
  0x99   : > { %2678 = dma.done.wait (%p3989_p0), %s251_s23, 2048  }
  0x9a   : > { %2680 = vsyncadd (%p3989_p0), %s251_s23, 4294965248  ;;  %p3990_p11 = scmp.eq.s32.totalorder %s2775_s22, 0 }
  0x9c   : > { %2682 = dma.done.wait (%p3990_p11), [#allocation6], 4160   ;;  %p3991_p6 = pmov %p3990_p11 }
  0x9e   : > { %2684 = vsyncadd (%p3991_p6), [#allocation6], 4294963136  ;;  %p3992_p10 = pmov %p3991_p6 }
  0x9f   : > { %p3993_p3 = pmov %p3991_p6 }
  0xa0   : > { %2686 = dma.done.wait (%p3992_p10), [#allocation9], 4112  }
  0xa1   : > { %2688 = vsyncadd (%p3993_p3), [#allocation9], 4294963184  ;;  %v2720_v0 = vmov 0   ;;  %v2283_v1 = vld [vmem:[#allocation5 + $0x4] ss:$16 sps:$4 sm:$0xff]   ;;  %v301_v34 = vld [vmem:[%s2976_s7 + $0x8] sm:$0xff] }
  0xa2   : > { %570 = vmatprep.mubr.bf16.mxu0 %v2720_v0  ;;  %683 = vmatprep.mubr.bf16.mxu1 %v2720_v0  ;;  %v2285_v2 = vld [vmem:[#allocation5 + $0xc] ss:$16 sps:$4 sm:$0xff]   ;;  %v2287_v3 = vld [vmem:[#allocation5] ss:$16 sps:$4 sm:$0xff]   ;;  %v2288_v4 = vld [vmem:[#allocation5 + $0x8] ss:$16 sps:$4 sm:$0xff]  }
  0xa3   : > { %538 = vmatprep.subr.bf16.mxu0 %v2283_v1  ;;  %651 = vmatprep.subr.bf16.mxu1 %v2285_v2  ;;  %v2289_v5 = vld [vmem:[#allocation5 + $0x24] ss:$16 sps:$4 sm:$0xff]   ;;  %v2291_v6 = vld [vmem:[#allocation5 + $0x2c] ss:$16 sps:$4 sm:$0xff]   ;;  %v2293_v7 = vld [vmem:[#allocation5 + $0x20] ss:$16 sps:$4 sm:$0xff]  }
  0xa4   : > { %539 = vmatpush1.bf16.msra.mxu0 %v2287_v3  ;;  %652 = vmatpush1.bf16.msra.mxu1 %v2288_v4  ;;  %v2294_v8 = vld [vmem:[#allocation5 + $0x28] ss:$16 sps:$4 sm:$0xff]   ;;  %v2295_v9 = vld [vmem:[#allocation5 + $0x44] ss:$16 sps:$4 sm:$0xff]   ;;  %v2297_v10 = vld [vmem:[#allocation5 + $0x4c] ss:$16 sps:$4 sm:$0xff]  }
  0xa5   : > { %540 = vmatprep.subr.bf16.mxu0 %v2289_v5  ;;  %653 = vmatprep.subr.bf16.mxu1 %v2291_v6  ;;  %v2299_v11 = vld [vmem:[#allocation5 + $0x40] ss:$16 sps:$4 sm:$0xff]   ;;  %v2300_v12 = vld [vmem:[#allocation5 + $0x48] ss:$16 sps:$4 sm:$0xff]   ;;  %v2301_v13 = vld [vmem:[#allocation5 + $0x64] ss:$16 sps:$4 sm:$0xff]  }
  0xa6   : > { %v2303_v14 = vld [vmem:[#allocation5 + $0x6c] ss:$16 sps:$4 sm:$0xff]   ;;  %v2305_v15 = vld [vmem:[#allocation5 + $0x60] ss:$16 sps:$4 sm:$0xff]   ;;  %v2306_v16 = vld [vmem:[#allocation5 + $0x68] ss:$16 sps:$4 sm:$0xff]  }
  0xa7   : > { %v2307_v17 = vld [vmem:[#allocation5 + $0x84] ss:$16 sps:$4 sm:$0xff]   ;;  %v2309_v18 = vld [vmem:[#allocation5 + $0x8c] ss:$16 sps:$4 sm:$0xff]   ;;  %v2311_v19 = vld [vmem:[#allocation5 + $0x80] ss:$16 sps:$4 sm:$0xff]  }
  0xa8   : > { %541 = vmatpush1.bf16.msra.mxu0 %v2293_v7  ;;  %654 = vmatpush1.bf16.msra.mxu1 %v2294_v8  ;;  %v2312_v20 = vld [vmem:[#allocation5 + $0x88] ss:$16 sps:$4 sm:$0xff]   ;;  %v2313_v21 = vld [vmem:[#allocation5 + $0xa4] ss:$16 sps:$4 sm:$0xff]   ;;  %v2315_v22 = vld [vmem:[#allocation5 + $0xac] ss:$16 sps:$4 sm:$0xff]  }
  0xa9   : > { %542 = vmatprep.subr.bf16.mxu0 %v2295_v9  ;;  %655 = vmatprep.subr.bf16.mxu1 %v2297_v10  ;;  %v2317_v23 = vld [vmem:[#allocation5 + $0xa0] ss:$16 sps:$4 sm:$0xff]   ;;  %v2318_v24 = vld [vmem:[#allocation5 + $0xa8] ss:$16 sps:$4 sm:$0xff]   ;;  %v2319_v25 = vld [vmem:[#allocation5 + $0xc4] ss:$16 sps:$4 sm:$0xff]  }
  0xaa   : > { %v2321_v26 = vld [vmem:[#allocation5 + $0xcc] ss:$16 sps:$4 sm:$0xff]   ;;  %v2323_v27 = vld [vmem:[#allocation5 + $0xc0] ss:$16 sps:$4 sm:$0xff]   ;;  %v2324_v28 = vld [vmem:[#allocation5 + $0xc8] ss:$16 sps:$4 sm:$0xff]  }
  0xab   : > { %v2325_v29 = vld [vmem:[#allocation5 + $0xe4] ss:$16 sps:$4 sm:$0xff]   ;;  %v2327_v30 = vld [vmem:[#allocation5 + $0xec] ss:$16 sps:$4 sm:$0xff]   ;;  %v2329_v31 = vld [vmem:[#allocation5 + $0xe0] ss:$16 sps:$4 sm:$0xff]  }
  0xac   : > { %543 = vmatpush1.bf16.msra.mxu0 %v2299_v11  ;;  %656 = vmatpush1.bf16.msra.mxu1 %v2300_v12  ;;  %v2330_v32 = vld [vmem:[#allocation5 + $0xe8] ss:$16 sps:$4 sm:$0xff]   ;;  %v300_v33 = vld [vmem:[%s2976_s7] sm:$0xff]  ;;  %v2335_v40 = vld [vmem:[#allocation8 + $0x48] sm:$0xff]   ;;  %s3826_s24 = scalar_lea.vmem [#allocation11], %s1981_s14  ;;  %s2058_s26 = sshll.u32 %s2775_s22, 11 }
  0xad   : > { %544 = vmatprep.subr.bf16.mxu0 %v2301_v13  ;;  %657 = vmatprep.subr.bf16.mxu1 %v2303_v14  ;;  %v2331_v35 = vld [vmem:[#allocation8 + $0x40] sm:$0xff]   ;;  %v316_v37 = vpack.c.bf16 %v301_v34, %v300_v33  ;;  %v302_v41 = vld [vmem:[%s2976_s7 + $0x10] sm:$0xff]  ;;  %v303_v42 = vld [vmem:[%s2976_s7 + $0x18] sm:$0xff]  ;;  %s1859_s9 = sshll.u32 %s3826_s24, 4  ;;  %s3861_s13 = scalar_lea.hbm %s3914_s5, %s2058_s26  ;;  %s3863_s9 = int_to_ptr.vmem [resolvable:$true] %s1859_s9 }
  0xae   : > { %v2333_v36 = vld [vmem:[#allocation8 + $0xc0] sm:$0xff]   ;;  %v2337_v43 = vld [vmem:[#allocation8 + $0xc8] sm:$0xff]   ;;  %v2339_v46 = vld [vmem:[#allocation8 + $0x50] sm:$0xff]   ;;  %v317_v48 = vpack.c.bf16 %v303_v42, %v302_v41  ;;  %s1846_s17 = scalar_lea.sflag [#allocation4], %s2970_s29  ;;  %s2633_s30 = scalar_lea.vmem %s3863_s9, 2048 }
  0xaf   : > { %v2332_v38 = vld [vmem:[#allocation8] sm:$0xff]   ;;  %v2336_v44 = vld [vmem:[#allocation8 + $0x8] sm:$0xff]   ;;  %v2341_v47 = vld [vmem:[#allocation8 + $0xd0] sm:$0xff]   ;;  %p2634_p4 = scmp.ne.s32.totalorder %s3863_s9, %s2633_s30  ;;  %s2721_s22 = smov [#allocation11]  }
  0xb0   : > { %545 = vmatpush1.bf16.msra.mxu0 %v2305_v15  ;;  %658 = vmatpush1.bf16.msra.mxu1 %v2306_v16  ;;  %v2334_v39 = vld [vmem:[#allocation8 + $0x80] sm:$0xff]   ;;  %v2338_v45 = vld [vmem:[#allocation8 + $0x88] sm:$0xff]   ;;  %v2340_v49 = vld [vmem:[#allocation8 + $0x10] sm:$0xff]   ;;  %s2637_s8 = sshll.u32 %s2721_s22, 4  ;;  %s2638_s8 = int_to_ptr.vmem [resolvable:$false] %s2637_s8 }
  0xb1   : > { %546 = vmatprep.subr.bf16.mxu0 %v2307_v17  ;;  %659 = vmatprep.subr.bf16.mxu1 %v2309_v18  ;;  %v2342_v50 = vld [vmem:[#allocation8 + $0x90] sm:$0xff]   ;;  %v304_v51 = vld [vmem:[%s2976_s7 + $0x20] sm:$0xff]  ;;  %v305_v52 = vld [vmem:[%s2976_s7 + $0x28] sm:$0xff]  ;;  %p2635_p5 = pnand %p2634_p4, %p2921_p8  ;;  %s2639_s10 = scalar_lea.vmem %s2638_s8, 4096 }
  0xb2   : > { %v2343_v53 = vld [vmem:[#allocation8 + $0x58] sm:$0xff]   ;;  %v318_v57 = vpack.c.bf16 %v305_v52, %v304_v51  ;;  %v306_v58 = vld [vmem:[%s2976_s7 + $0x30] sm:$0xff]  ;;  %v309_v62 = vld [vmem:[%s2976_s7 + $0x48] sm:$0xff]  ;;  %p2640_p12 = scmp.lt.s32.totalorder %s3863_s9, %s2638_s8  ;;  %p2641_p2 = scmp.lt.s32.totalorder %s2639_s10, %s2633_s30 }
  0xb3   : > { %v2345_v54 = vld [vmem:[#allocation8 + $0xd8] sm:$0xff]   ;;  %v310_v1 = vld [vmem:[%s2976_s7 + $0x50] sm:$0xff]  ;;  %v313_v5 = vld [vmem:[%s2976_s7 + $0x68] sm:$0xff]  ;;  %p2636_p7 = pneg %p2635_p5 }
  0xb4   : > { %547 = vmatpush1.bf16.msra.mxu0 %v2311_v19  ;;  %660 = vmatpush1.bf16.msra.mxu1 %v2312_v20  ;;  %v2344_v55 = vld [vmem:[#allocation8 + $0x18] sm:$0xff]   ;;  %v314_v7 = vld [vmem:[%s2976_s7 + $0x70] sm:$0xff]  ;;  %v2347_v10 = vld [vmem:[#allocation8 + $0x60] sm:$0xff]   ;;  %p2642_p1 = por %p2641_p2, %p2640_p12 }
  0xb5   : > { %548 = vmatprep.subr.bf16.mxu0 %v2313_v21  ;;  %661 = vmatprep.subr.bf16.mxu1 %v2315_v22  ;;  %v2346_v56 = vld [vmem:[#allocation8 + $0x98] sm:$0xff]   ;;  %v2348_v11 = vld [vmem:[#allocation8 + $0x20] sm:$0xff]   ;;  %v2351_v14 = vld [vmem:[#allocation8 + $0x68] sm:$0xff]  }
  0xb6   : > { %v307_v59 = vld [vmem:[%s2976_s7 + $0x38] sm:$0xff]  ;;  %v308_v61 = vld [vmem:[%s2976_s7 + $0x40] sm:$0xff]  ;;  %v2352_v15 = vld [vmem:[#allocation8 + $0x28] sm:$0xff]   ;;  %p2643_p13 = pnand %p2642_p1, %p2636_p7 }
  0xb7   : > { %v319_v60 = vpack.c.bf16 %v307_v59, %v306_v58  ;;  %v320_v63 = vpack.c.bf16 %v309_v62, %v308_v61  ;;  %v311_v2 = vld [vmem:[%s2976_s7 + $0x58] sm:$0xff]  ;;  %v312_v4 = vld [vmem:[%s2976_s7 + $0x60] sm:$0xff]  ;;  %v2353_v16 = vld [vmem:[#allocation8 + $0xe8] sm:$0xff]  }
  0xb8   : > { %549 = vmatpush1.bf16.msra.mxu0 %v2317_v23  ;;  %662 = vmatpush1.bf16.msra.mxu1 %v2318_v24  ;;  %v321_v3 = vpack.c.bf16 %v311_v2, %v310_v1  ;;  %v322_v6 = vpack.c.bf16 %v313_v5, %v312_v4  ;;  %v315_v8 = vld [vmem:[%s2976_s7 + $0x78] sm:$0xff]  ;;  %v2349_v12 = vld [vmem:[#allocation8 + $0xe0] sm:$0xff]   ;;  %v2354_v17 = vld [vmem:[#allocation8 + $0xa8] sm:$0xff]  }
  0xb9   : > { %550 = vmatprep.subr.bf16.mxu0 %v2319_v25  ;;  %663 = vmatprep.subr.bf16.mxu1 %v2321_v26  ;;  %v323_v9 = vpack.c.bf16 %v315_v8, %v314_v7  ;;  %v2350_v13 = vld [vmem:[#allocation8 + $0xa0] sm:$0xff]   ;;  %v2356_v18 = vld [vmem:[#allocation8 + $0x30] sm:$0xff]   ;;  %v2359_v21 = vld [vmem:[#allocation8 + $0x78] sm:$0xff]   ;;  %v358_v25 = vlaneseq }
  0xba   : > { %v2357_v19 = vld [vmem:[#allocation8 + $0xf0] sm:$0xff]   ;;  %v2361_v22 = vld [vmem:[#allocation8 + $0xf8] sm:$0xff]  }
  0xbb   : > { %v2358_v20 = vld [vmem:[#allocation8 + $0xb0] sm:$0xff]   ;;  %v2360_v23 = vld [vmem:[#allocation8 + $0x38] sm:$0xff]   ;;  %v359_v26 = vshrl.u32 %v358_v25, 7 }
  0xbc   : > { %551 = vmatpush1.bf16.msra.mxu0 %v2323_v27  ;;  %664 = vmatpush1.bf16.msra.mxu1 %v2324_v28  ;;  %v2362_v24 = vld [vmem:[#allocation8 + $0xb8] sm:$0xff]  }
  0xbd   : > { %552 = vmatprep.subr.bf16.mxu0 %v2325_v29  ;;  %665 = vmatprep.subr.bf16.mxu1 %v2327_v30  ;;  %v360_v27 = vsub.s32 0, %v359_v26  ;;  %v368_v28 = vsub.s32 2, %v359_v26  ;;  %v356_v29 = vld [vmem:[#allocation7] sm:$0xf]  ;;  %v364_v30 = vsub.s32 1, %v359_v26 }
  0xbf   : > { %v3024_v33 = vrot.slane %v356_v29, %v368_v28  ;;  %v3026_v34 = vrot.slane %v356_v29, %v364_v30 }
  0xc0   : > { %553 = vmatpush1.bf16.msra.mxu0 %v2329_v31  ;;  %666 = vmatpush1.bf16.msra.mxu1 %v2330_v32  ;;  %v372_v31 = vsub.s32 3, %v359_v26  ;;  %v3022_v32 = vrot.slane %v356_v29, %v360_v27 }
  0xc1   : > { %2059 = vmatprep.subr.bf16.mxu0 %v2331_v35  ;;  %2123 = vmatprep.subr.bf16.mxu1 %v2333_v36 }
  0xc2   : > { %v3028_v35 = vrot.slane %v356_v29, %v372_v31 }
  0xc3   : > { %571 = vmatmul.mubr.bf16.vlgmr.msra.gmra.mrb[0].mxu0 %v316_v37  ;;  %684 = vmatmul.mubr.bf16.vlgmr.msra.gmra.mrb[0].mxu1 %v316_v37 }
  0xc4   : > { %580 = vmatprep.mubr.bf16.mxu0 %v2720_v0  ;;  %693 = vmatprep.mubr.bf16.mxu1 %v2720_v0 }
  0xc5   : > { %2060 = vmatpush3.bf16.msra.mxu0 %v2332_v38  ;;  %2124 = vmatpush3.bf16.msra.mxu1 %v2334_v39 }
  0xc6   : > { %2061 = vmatprep.subr.bf16.mxu0 %v2335_v40  ;;  %2125 = vmatprep.subr.bf16.mxu1 %v2337_v43 }
  0xc9   : > { %2062 = vmatpush3.bf16.msra.mxu0 %v2336_v44  ;;  %2126 = vmatpush3.bf16.msra.mxu1 %v2338_v45 }
  0xca   : > { %2063 = vmatprep.subr.bf16.mxu0 %v2339_v46  ;;  %2127 = vmatprep.subr.bf16.mxu1 %v2341_v47 }
  0xcb   : > { %581 = vmatmul.mubr.bf16.gmra.mrb[4].mxu0 %v317_v48  ;;  %694 = vmatmul.mubr.bf16.gmra.mrb[4].mxu1 %v317_v48 }
  0xcc   : > { %590 = vmatprep.mubr.bf16.mxu0 %v2720_v0  ;;  %703 = vmatprep.mubr.bf16.mxu1 %v2720_v0 }
  0xcd   : > { %2064 = vmatpush3.bf16.msra.mxu0 %v2340_v49  ;;  %2128 = vmatpush3.bf16.msra.mxu1 %v2342_v50 }
  0xce   : > { %2065 = vmatprep.subr.bf16.mxu0 %v2343_v53  ;;  %2129 = vmatprep.subr.bf16.mxu1 %v2345_v54 }
  0xd1   : > { %2066 = vmatpush3.bf16.msra.mxu0 %v2344_v55  ;;  %2130 = vmatpush3.bf16.msra.mxu1 %v2346_v56 }
  0xd2   : > { %2067 = vmatprep.subr.bf16.mxu0 %v2347_v10  ;;  %2131 = vmatprep.subr.bf16.mxu1 %v2349_v12 }
  0xd3   : > { %591 = vmatmul.mubr.bf16.gmra.mrb[8].mxu0 %v318_v57  ;;  %704 = vmatmul.mubr.bf16.gmra.mrb[8].mxu1 %v318_v57 }
  0xd4   : > { %600 = vmatprep.mubr.bf16.mxu0 %v2720_v0  ;;  %713 = vmatprep.mubr.bf16.mxu1 %v2720_v0 }
  0xd5   : > { %2068 = vmatpush3.bf16.msra.mxu0 %v2348_v11  ;;  %2132 = vmatpush3.bf16.msra.mxu1 %v2350_v13 }
  0xd6   : > { %2069 = vmatprep.subr.bf16.mxu0 %v2351_v14  ;;  %2133 = vmatprep.subr.bf16.mxu1 %v2353_v16 }
  0xd9   : > { %2070 = vmatpush3.bf16.msra.mxu0 %v2352_v15  ;;  %2134 = vmatpush3.bf16.msra.mxu1 %v2354_v17 }
  0xda   : > { %2135 = vmatprep.subr.bf16.mxu1 %v2357_v19 }
  0xdb   : > { %601 = vmatmul.mubr.bf16.gmra.mrb[12].mxu0 %v319_v60  ;;  %714 = vmatmul.mubr.bf16.gmra.mrb[12].mxu1 %v319_v60 }
  0xdc   : > { %610 = vmatprep.mubr.bf16.mxu0 %v2720_v0  ;;  %723 = vmatprep.mubr.bf16.mxu1 %v2720_v0 }
  0xdd   : > { %2136 = vmatpush3.bf16.msra.mxu1 %v2358_v20 }
  0xde   : > { %2137 = vmatprep.subr.bf16.mxu1 %v2361_v22 }
  0xe1   : > { %2138 = vmatpush3.bf16.msra.mxu1 %v2362_v24 }
  0xe3   : > { %611 = vmatmul.mubr.bf16.gmra.mrb[16].mxu0 %v320_v63  ;;  %724 = vmatmul.mubr.bf16.gmra.mrb[16].mxu1 %v320_v63 }
  0xe4   : > { %620 = vmatprep.mubr.bf16.mxu0 %v2720_v0  ;;  %733 = vmatprep.mubr.bf16.mxu1 %v2720_v0 }
  0xeb   : > { %621 = vmatmul.mubr.bf16.gmra.mrb[20].mxu0 %v321_v3  ;;  %734 = vmatmul.mubr.bf16.gmra.mrb[20].mxu1 %v321_v3 }
  0xec   : > { %630 = vmatprep.mubr.bf16.mxu0 %v2720_v0  ;;  %743 = vmatprep.mubr.bf16.mxu1 %v2720_v0 }
  0xf3   : > { %631 = vmatmul.mubr.bf16.gmra.mrb[24].mxu0 %v322_v6  ;;  %744 = vmatmul.mubr.bf16.gmra.mrb[24].mxu1 %v322_v6 }
  0xf4   : > { %640 = vmatprep.mubr.bf16.mxu0 %v2720_v0  ;;  %753 = vmatprep.mubr.bf16.mxu1 %v2720_v0  ;;  %v2355_v0 = vld [vmem:[#allocation8 + $0x70] sm:$0xff]  }
  0xf5   : > { %2071 = vmatprep.subr.bf16.mxu0 %v2355_v0 }
  0xf6   : > { %2072 = vmatpush3.bf16.msra.mxu0 %v2356_v18 }
  0xf7   : > { %2073 = vmatprep.subr.bf16.mxu0 %v2359_v21 }
  0xfa   : > { %2074 = vmatpush3.bf16.msra.mxu0 %v2360_v23 }
  0xfb   : > { %641 = vmatmul.mubr.bf16.gmra.mrb[28].mxu0 %v323_v9  ;;  %754 = vmatmul.mubr.bf16.gmra.mrb[28].mxu1 %v323_v9 }
 0x196   : > { %v572_v36 = vpop.f32.mrb[0].mxu0  ;;  %v685_v37 = vpop.f32.mrb[0].mxu1 }
 0x197   : > { %v573_v38 = vadd.f32 %v572_v36, %v3022_v32  ;;  %v686_v39 = vadd.f32 %v685_v37, %v3024_v33  ;;  %v574_v40 = vpop.f32.mrb[1].mxu0  ;;  %v687_v41 = vpop.f32.mrb[1].mxu1 }
 0x198   : > { %v3033_v42 = vadd.f32 %v574_v40, %v3026_v34  ;;  %v3036_v43 = vadd.f32 %v687_v41, %v3028_v35  ;;  %v576_v44 = vpop.f32.mrb[2].mxu0  ;;  %v689_v45 = vpop.f32.mrb[2].mxu1 }
 0x199   : > { %v828_v46 = vmul.f32 0.044715, %v573_v38  ;;  %v830_v47 = vmul.f32 0.044715, %v686_v39  ;;  %v577_v48 = vadd.f32 %v576_v44, %v3022_v32  ;;  %v690_v49 = vadd.f32 %v689_v45, %v3024_v33  ;;  %v578_v50 = vpop.f32.mrb[3].mxu0  ;;  %v691_v51 = vpop.f32.mrb[3].mxu1 }
 0x19a   : > { %v829_v54 = vmul.f32 0.044715, %v3033_v42  ;;  %v831_v55 = vmul.f32 0.044715, %v3036_v43  ;;  %v3043_v60 = vadd.f32 %v578_v50, %v3026_v34  ;;  %v3046_v62 = vadd.f32 %v691_v51, %v3028_v35 }
 0x19b   : > { %v892_v52 = vmul.f32 %v828_v46, %v573_v38  ;;  %v894_v53 = vmul.f32 %v830_v47, %v686_v39  ;;  %v832_v56 = vmul.f32 0.044715, %v577_v48  ;;  %v834_v59 = vmul.f32 0.044715, %v690_v49 }
 0x19c   : > { %v893_v3 = vmul.f32 %v829_v54, %v3033_v42  ;;  %v895_v7 = vmul.f32 %v831_v55, %v3036_v43  ;;  %v3056_v13 = vmul.f32 0.5, %v573_v38  ;;  %v833_v16 = vmul.f32 0.044715, %v3043_v60 }
 0x19d   : > { %v956_v57 = vmul.f32 %v892_v52, %v573_v38  ;;  %v958_v58 = vmul.f32 %v894_v53, %v686_v39  ;;  %v896_v61 = vmul.f32 %v832_v56, %v577_v48  ;;  %v898_v4 = vmul.f32 %v834_v59, %v690_v49 }
 0x19e   : > { %v582_v63 = vpop.f32.mrb[4].mxu0  ;;  %v695_v1 = vpop.f32.mrb[4].mxu1  ;;  %v3059_v19 = vmul.f32 0.5, %v686_v39  ;;  %v835_v21 = vmul.f32 0.044715, %v3046_v62  ;;  %v3068_v26 = vmul.f32 %v893_v3, %v3033_v42  ;;  %v3071_v27 = vmul.f32 %v895_v7, %v3036_v43 }
 0x19f   : > { %v1020_v2 = vadd.f32 %v956_v57, %v573_v38  ;;  %v584_v5 = vpop.f32.mrb[5].mxu0  ;;  %v697_v6 = vpop.f32.mrb[5].mxu1  ;;  %v960_v8 = vmul.f32 %v896_v61, %v577_v48  ;;  %v3051_v9 = vadd.f32 %v582_v63, %v3022_v32  ;;  %v3054_v10 = vadd.f32 %v695_v1, %v3024_v33 }
 0x1a0   : > { %v586_v11 = vpop.f32.mrb[6].mxu0  ;;  %v699_v12 = vpop.f32.mrb[6].mxu1  ;;  %v1022_v14 = vadd.f32 %v958_v58, %v686_v39  ;;  %v962_v15 = vmul.f32 %v898_v4, %v690_v49  ;;  %v3065_v25 = vadd.f32 %v584_v5, %v3026_v34  ;;  %v3073_v28 = vmul.f32 0.5, %v577_v48 }
 0x1a1   : > { %3994 = vst [vmem:[#allocation16_spill] sm:$0xff] %v3051_v9  ;;  %3995 = vst [vmem:[#allocation17_spill] sm:$0xff] %v3054_v10  ;;  %v588_v17 = vpop.f32.mrb[7].mxu0  ;;  %v701_v0 = vpop.f32.mrb[7].mxu1  ;;  %v1084_v18 = vmul.f32 0.7978845, %v1020_v2  ;;  %v1024_v20 = vadd.f32 %v960_v8, %v577_v48  ;;  %v897_v31 = vmul.f32 %v833_v16, %v3043_v60  ;;  %v3079_v36 = vadd.f32 %v697_v6, %v3028_v35 }
 0x1a2   : > { %v1026_v22 = vadd.f32 %v962_v15, %v690_v49  ;;  %v836_v23 = vmul.f32 0.044715, %v3051_v9  ;;  %v838_v24 = vmul.f32 0.044715, %v3054_v10  ;;  %v3075_v29 = vmul.f32 0.5, %v690_v49 }
 0x1a3   : > { %v1086_v30 = vmul.f32 0.7978845, %v1022_v14  ;;  %3996 = vst [vmem:[#allocation18_spill] sm:$0xff] %v3079_v36  ;;  %v3082_v37 = vadd.f32 %v586_v11, %v3022_v32  ;;  %v1088_v38 = vmul.f32 0.7978845, %v1024_v20  ;;  %v899_v39 = vmul.f32 %v835_v21, %v3046_v62 }
 0x1a4   : > { %v837_v40 = vmul.f32 0.044715, %v3065_v25  ;;  %v3087_v41 = vadd.f32 %v699_v12, %v3024_v33  ;;  %2363 = vtanh.f32 %v1084_v18  ;;  %v1090_v46 = vmul.f32 0.7978845, %v1026_v22 }
 0x1a5   : > { %3997 = vst [vmem:[#allocation19_spill] sm:$0xff] %v3082_v37  ;;  %v900_v47 = vmul.f32 %v836_v23, %v3051_v9  ;;  %v902_v48 = vmul.f32 %v838_v24, %v3054_v10  ;;  %v839_v51 = vmul.f32 0.044715, %v3079_v36  ;;  %v3093_v52 = vadd.f32 %v588_v17, %v3026_v34 }
 0x1a6   : > { %3998 = vst [vmem:[#allocation20_spill] sm:$0xff] %v3087_v41  ;;  %v592_v44 = vpop.f32.mrb[8].mxu0  ;;  %v705_v45 = vpop.f32.mrb[8].mxu1  ;;  %v3096_v53 = vadd.f32 %v701_v0, %v3028_v35  ;;  %2365 = vtanh.f32 %v1086_v30  ;;  %v840_v57 = vmul.f32 0.044715, %v3082_v37  ;;  %v3107_v1 = vmul.f32 %v897_v31, %v3043_v60 }
 0x1a7   : > { %v594_v49 = vpop.f32.mrb[9].mxu0  ;;  %v707_v50 = vpop.f32.mrb[9].mxu1  ;;  %v3099_v54 = vadd.f32 %v592_v44, %v3022_v32  ;;  %v842_v58 = vmul.f32 0.044715, %v3087_v41  ;;  %v3104_v59 = vadd.f32 %v705_v45, %v3024_v33  ;;  %2367 = vtanh.f32 %v1088_v38 }
 0x1a8   : > { %3999 = vst [vmem:[#allocation21_spill] sm:$0xff] %v3096_v53  ;;  %v596_v55 = vpop.f32.mrb[10].mxu0  ;;  %v709_v56 = vpop.f32.mrb[10].mxu1  ;;  %v901_v2 = vmul.f32 %v837_v40, %v3065_v25  ;;  %v841_v3 = vmul.f32 0.044715, %v3093_v52  ;;  %v3115_v7 = vadd.f32 %v594_v49, %v3026_v34  ;;  %2369 = vtanh.f32 %v1090_v46 }
 0x1a9   : > { %4000 = vst [vmem:[#allocation22_spill] sm:$0xff] %v3099_v54  ;;  %4001 = vst [vmem:[#allocation23_spill] sm:$0xff] %v3104_v59  ;;  %v598_v61 = vpop.f32.mrb[11].mxu0  ;;  %v711_v63 = vpop.f32.mrb[11].mxu1  ;;  %v843_v4 = vmul.f32 0.044715, %v3096_v53  ;;  %v3118_v8 = vmul.f32 %v899_v39, %v3046_v62  ;;  %v3121_v11 = vmul.f32 %v900_v47, %v3051_v9  ;;  %v3124_v12 = vmul.f32 %v902_v48, %v3054_v10 }
 0x1aa   : > { %v844_v5 = vmul.f32 0.044715, %v3099_v54  ;;  %v846_v6 = vmul.f32 0.044715, %v3104_v59  ;;  %4002 = vst [vmem:[#allocation24_spill] sm:$0xff] %v3115_v7  ;;  %v903_v14 = vmul.f32 %v839_v51, %v3079_v36  ;;  %v904_v15 = vmul.f32 %v840_v57, %v3082_v37 }
 0x1ab   : > { %4003 = vst [vmem:[#allocation25_spill] sm:$0xff] %v3121_v11  ;;  %4004 = vst [vmem:[#allocation26_spill] sm:$0xff] %v3124_v12  ;;  %v906_v16 = vmul.f32 %v842_v58, %v3087_v41  ;;  %v845_v17 = vmul.f32 0.044715, %v3115_v7  ;;  %v905_v0 = vmul.f32 %v841_v3, %v3093_v52  ;;  %v3132_v18 = vadd.f32 %v707_v50, %v3028_v35 }
 0x1ac   : > { %v3135_v20 = vadd.f32 %v596_v55, %v3022_v32  ;;  %v3138_v21 = vadd.f32 %v709_v56, %v3024_v33  ;;  %v3141_v24 = vmul.f32 %v901_v2, %v3065_v25  ;;  %v907_v30 = vmul.f32 %v843_v4, %v3096_v53 }
 0x1ad   : > { %4005 = vst [vmem:[#allocation27_spill] sm:$0xff] %v3132_v18  ;;  %v908_v31 = vmul.f32 %v844_v5, %v3099_v54  ;;  %v910_v38 = vmul.f32 %v846_v6, %v3104_v59  ;;  %v909_v44 = vmul.f32 %v845_v17, %v3115_v7  ;;  %v3148_v45 = vadd.f32 %v598_v61, %v3026_v34 }
 0x1ae   : > { %v602_v22 = vpop.f32.mrb[12].mxu0  ;;  %v715_v23 = vpop.f32.mrb[12].mxu1  ;;  %v3151_v46 = vadd.f32 %v711_v63, %v3028_v35  ;;  %v3159_v51 = vmul.f32 %v903_v14, %v3079_v36  ;;  %v3162_v55 = vmul.f32 %v904_v15, %v3082_v37  ;;  %v3165_v56 = vmul.f32 %v906_v16, %v3087_v41 }
 0x1af   : > { %v604_v39 = vpop.f32.mrb[13].mxu0  ;;  %v717_v40 = vpop.f32.mrb[13].mxu1  ;;  %v3154_v47 = vadd.f32 %v602_v22, %v3022_v32  ;;  %v3168_v57 = vadd.f32 %v715_v23, %v3024_v33  ;;  %v3171_v63 = vmul.f32 %v905_v0, %v3093_v52  ;;  %v847_v2 = vmul.f32 0.044715, %v3132_v18 }
 0x1b0   : > { %v606_v48 = vpop.f32.mrb[14].mxu0  ;;  %v719_v49 = vpop.f32.mrb[14].mxu1  ;;  %4007 = vst [vmem:[#allocation29_spill] sm:$0xff] %v3159_v51  ;;  %4008 = vst [vmem:[#allocation30_spill] sm:$0xff] %v3162_v55  ;;  %v848_v3 = vmul.f32 0.044715, %v3135_v20  ;;  %v3179_v6 = vmul.f32 %v907_v30, %v3096_v53  ;;  %v3184_v16 = vadd.f32 %v604_v39, %v3026_v34  ;;  %v3189_v0 = vmul.f32 %v908_v31, %v3099_v54 }
 0x1b1   : > { %4006 = vst [vmem:[#allocation28_spill] sm:$0xff] %v3154_v47  ;;  %v3156_v50 = vpop.eup %2363  ;;  %4009 = vst [vmem:[#allocation31_spill] sm:$0xff] %v3165_v56  ;;  %v608_v58 = vpop.f32.mrb[15].mxu0  ;;  %v850_v4 = vmul.f32 0.044715, %v3138_v21  ;;  %v3192_v22 = vmul.f32 %v910_v38, %v3104_v59  ;;  %v3195_v23 = vmul.f32 %v909_v44, %v3115_v7  ;;  %v3201_v39 = vadd.f32 %v717_v40, %v3028_v35 }
 0x1b2   : > { %4010 = vst [vmem:[#allocation32_spill] sm:$0xff] %v3168_v57  ;;  %v721_v61 = vpop.f32.mrb[15].mxu1  ;;  %4011 = vst [vmem:[#allocation33_spill] sm:$0xff] %v3171_v63  ;;  %v3176_v5 = vpop.eup %2365  ;;  %v849_v14 = vmul.f32 0.044715, %v3148_v45  ;;  %v3204_v12 = vadd.f32 %v606_v48, %v3022_v32  ;;  %v911_v38 = vmul.f32 %v847_v2, %v3132_v18  ;;  %v3212_v59 = vadd.f32 %v719_v49, %v3024_v33 }
 0x1b3   : > { %4012 = vst [vmem:[#allocation34_spill] sm:$0xff] %v3179_v6  ;;  %v851_v15 = vmul.f32 0.044715, %v3151_v46  ;;  %4013 = vst [vmem:[#allocation35_spill] sm:$0xff] %v3184_v16  ;;  %v3186_v17 = vpop.eup %2367  ;;  %v852_v30 = vmul.f32 0.044715, %v3154_v47  ;;  %v914_v44 = vmul.f32 %v850_v4, %v3138_v21  ;;  %v3223_v49 = vadd.f32 %v721_v61, %v3028_v35 }
 0x1b4   : > { %4014 = vst [vmem:[#allocation36_spill] sm:$0xff] %v3189_v0  ;;  %4015 = vst [vmem:[#allocation37_spill] sm:$0xff] %v3192_v22  ;;  %v854_v56 = vmul.f32 0.044715, %v3168_v57  ;;  %v853_v41 = vmul.f32 0.044715, %v3184_v16  ;;  %v3206_v31 = vpop.eup %2369  ;;  %v912_v22 = vmul.f32 %v848_v3, %v3135_v20  ;;  %v3220_v3 = vadd.f32 %v608_v58, %v3026_v34 }
 0x1b5   : > { %4016 = vst [vmem:[#allocation38_spill] sm:$0xff] %v3195_v23  ;;  %4017 = vst [vmem:[#allocation39_spill] sm:$0xff] %v3201_v39  ;;  %v913_v23 = vmul.f32 %v849_v14, %v3148_v45  ;;  %v915_v40 = vmul.f32 %v851_v15, %v3151_v46  ;;  %v855_v48 = vmul.f32 0.044715, %v3201_v39  ;;  %v856_v7 = vmul.f32 0.044715, %v3204_v12 }
 0x1b6   : > { %4018 = vst [vmem:[#allocation40_spill] sm:$0xff] %v3204_v12  ;;  %4019 = vst [vmem:[#allocation41_spill] sm:$0xff] %v3212_v59  ;;  %v612_v0 = vpop.f32.mrb[16].mxu0  ;;  %v725_v54 = vpop.f32.mrb[16].mxu1  ;;  %v858_v2 = vmul.f32 0.044715, %v3212_v59  ;;  %v916_v15 = vmul.f32 %v852_v30, %v3154_v47  ;;  %v918_v11 = vmul.f32 %v854_v56, %v3168_v57  ;;  %v917_v9 = vmul.f32 %v853_v41, %v3184_v16 }
 0x1b7   : > { %v614_v10 = vpop.f32.mrb[17].mxu0  ;;  %v727_v55 = vpop.f32.mrb[17].mxu1  ;;  %4020 = vst [vmem:[#allocation42_spill] sm:$0xff] %v3220_v3  ;;  %4021 = vst [vmem:[#allocation43_spill] sm:$0xff] %v3223_v49  ;;  %v3226_v4 = vadd.f32 %v612_v0, %v3022_v32  ;;  %v3232_v6 = vadd.f32 %v725_v54, %v3024_v33  ;;  %v919_v61 = vmul.f32 %v855_v48, %v3201_v39  ;;  %v857_v36 = vmul.f32 0.044715, %v3220_v3 }
 0x1b8   : > { %v616_v14 = vpop.f32.mrb[18].mxu0  ;;  %v729_v37 = vpop.f32.mrb[18].mxu1  ;;  %v920_v0 = vmul.f32 %v856_v7, %v3204_v12  ;;  %v922_v51 = vmul.f32 %v858_v2, %v3212_v59  ;;  %v3243_v30 = vmul.f32 %v911_v38, %v3132_v18  ;;  %v859_v41 = vmul.f32 0.044715, %v3223_v49 }
 0x1b9   : > { %4022 = vst [vmem:[#allocation44_spill] sm:$0xff] %v3226_v4  ;;  %4023 = vst [vmem:[#allocation45_spill] sm:$0xff] %v3232_v6  ;;  %v3234_v53 = vpop.f32.mrb[19].mxu0  ;;  %v3236_v58 = vpop.f32.mrb[19].mxu1  ;;  %v860_v54 = vmul.f32 0.044715, %v3226_v4  ;;  %v3249_v63 = vmul.f32 %v912_v22, %v3135_v20  ;;  %v3252_v48 = vmul.f32 %v914_v44, %v3138_v21  ;;  %v3255_v7 = vmul.f32 %v913_v23, %v3148_v45 }
 0x1ba   : > { %4024 = vst [vmem:[#allocation46_spill] sm:$0xff] %v3243_v30  ;;  %v862_v56 = vmul.f32 0.044715, %v3232_v6  ;;  %v3258_v2 = vadd.f32 %v614_v10, %v3026_v34  ;;  %v3261_v38 = vmul.f32 %v915_v40, %v3151_v46  ;;  %v3264_v30 = vmul.f32 %v916_v15, %v3154_v47 }
 0x1bb   : > { %4025 = vst [vmem:[#allocation47_spill] sm:$0xff] %v3252_v48  ;;  %v3267_v18 = vmul.f32 %v918_v11, %v3168_v57  ;;  %v921_v22 = vmul.f32 %v857_v36, %v3220_v3  ;;  %v3271_v44 = vmul.f32 %v917_v9, %v3184_v16  ;;  %v3274_v23 = vmul.f32 %v919_v61, %v3201_v39 }
 0x1bc   : > { %4026 = vst [vmem:[#allocation48_spill] sm:$0xff] %v3258_v2  ;;  %4027 = vst [vmem:[#allocation49_spill] sm:$0xff] %v3264_v30  ;;  %v3277_v10 = vmul.f32 %v920_v0, %v3204_v12  ;;  %v3280_v40 = vmul.f32 %v922_v51, %v3212_v59  ;;  %v923_v30 = vmul.f32 %v859_v41, %v3223_v49  ;;  %v861_v0 = vmul.f32 0.044715, %v3258_v2 }
 0x1bd   : > { %4028 = vst [vmem:[#allocation50_spill] sm:$0xff] %v3267_v18  ;;  %4029 = vst [vmem:[#allocation51_spill] sm:$0xff] %v3271_v44  ;;  %v924_v11 = vmul.f32 %v860_v54, %v3226_v4  ;;  %v926_v36 = vmul.f32 %v862_v56, %v3232_v6  ;;  %v1021_v9 = vadd.f32 %v3068_v26, %v3033_v42 }
 0x1be   : > { %4030 = vst [vmem:[#allocation52_spill] sm:$0xff] %v3274_v23  ;;  %4031 = vst [vmem:[#allocation53_spill] sm:$0xff] %v3277_v10  ;;  %v622_v48 = vpop.f32.mrb[20].mxu0  ;;  %v735_v15 = vpop.f32.mrb[20].mxu1  ;;  %v3291_v57 = vadd.f32 %v727_v55, %v3028_v35  ;;  %v1025_v51 = vadd.f32 %v3107_v1, %v3043_v60  ;;  %v1023_v41 = vadd.f32 %v3071_v27, %v3036_v43 }
 0x1bf   : > { %4032 = vst [vmem:[#allocation54_spill] sm:$0xff] %v3280_v40  ;;  %v624_v18 = vpop.f32.mrb[21].mxu0  ;;  %v3287_v61 = vpop.f32.mrb[21].mxu1  ;;  %v3302_v26 = vmul.f32 %v921_v22, %v3220_v3  ;;  %v3305_v40 = vmul.f32 0.5, %v3033_v42  ;;  %v1085_v59 = vmul.f32 0.7978845, %v1021_v9  ;;  %v1027_v55 = vadd.f32 %v3118_v8, %v3046_v62 }
 0x1c0   : > { %4033 = vst [vmem:[#allocation55_spill] sm:$0xff] %v3291_v57  ;;  %v3297_v54 = vpop.f32.mrb[22].mxu0  ;;  %v3299_v56 = vpop.f32.mrb[22].mxu1  ;;  %v1089_v12 = vmul.f32 0.7978845, %v1025_v51  ;;  %v3314_v47 = vadd.f32 %v616_v14, %v3022_v32  ;;  %v3317_v23 = vadd.f32 %v729_v37, %v3024_v33  ;;  %v3320_v22 = vmul.f32 %v923_v30, %v3223_v49 }
 0x1c1   : > { %4034 = vst [vmem:[#allocation56_spill] sm:$0xff] %v3302_v26  ;;  %v3309_v10 = vpop.f32.mrb[23].mxu0  ;;  %v3311_v1 = vpop.f32.mrb[23].mxu1  ;;  %v1087_v27 = vmul.f32 0.7978845, %v1023_v41  ;;  %2371 = vtanh.f32 %v1085_v59  ;;  %v1212_v9 = vadd.f32 1.0, %v3156_v50  ;;  %v925_v30 = vmul.f32 %v861_v0, %v3258_v2 }
 0x1c2   : > { %4035 = vst [vmem:[#allocation57_spill] sm:$0xff] %v3314_v47  ;;  %4036 = vst [vmem:[#allocation58_spill] sm:$0xff] %v3317_v23  ;;  %v1091_v42 = vmul.f32 0.7978845, %v1027_v55  ;;  %v863_v8 = vmul.f32 0.044715, %v3291_v57  ;;  %2373 = vtanh.f32 %v1089_v12 }
 0x1c3   : > { %4037 = vst [vmem:[#allocation59_spill] sm:$0xff] %v3320_v22  ;;  %v864_v39 = vmul.f32 0.044715, %v3314_v47  ;;  %v1216_v51 = vadd.f32 1.0, %v3186_v17  ;;  %2375 = vtanh.f32 %v1087_v27  ;;  %v866_v14 = vmul.f32 0.044715, %v3317_v23 }
 0x1c4   : > { %v1214_v37 = vadd.f32 1.0, %v3176_v5  ;;  %v1218_v41 = vadd.f32 1.0, %v3206_v31  ;;  %2377 = vtanh.f32 %v1091_v42  ;;  %v3331_v59 = vmul.f32 %v1212_v9, %v3056_v13 }
 0x1c5   : > { %v3334_v50 = vmul.f32 %v1216_v51, %v3073_v28  ;;  %v3348_v31 = vadd.f32 %v3234_v53, %v3026_v34  ;;  %v3352_v13 = vadd.f32 %v3236_v58, %v3028_v35  ;;  %v3359_v27 = vmul.f32 %v924_v11, %v3226_v4 }
 0x1c6   : > { %v3336_v12 = vpop.f32.mrb[24].mxu0  ;;  %v3338_v55 = vpop.f32.mrb[24].mxu1  ;;  %v3341_v17 = vmul.f32 %v1214_v37, %v3059_v19  ;;  %v3344_v5 = vmul.f32 %v1218_v41, %v3075_v29  ;;  %v927_v19 = vmul.f32 %v863_v8, %v3291_v57  ;;  %v3365_v42 = vadd.f32 %v622_v48, %v3022_v32 }
 0x1c7   : > { %v3354_v28 = vpop.f32.mrb[25].mxu0  ;;  %v3356_v0 = vpop.f32.mrb[25].mxu1  ;;  %4038 = vst [vmem:[#allocation60_spill] sm:$0xff] %v3359_v27  ;;  %v928_v58 = vmul.f32 %v864_v39, %v3314_v47  ;;  %v930_v51 = vmul.f32 %v866_v14, %v3317_v23  ;;  %v3376_v37 = vadd.f32 %v735_v15, %v3024_v33  ;;  %v3383_v48 = vmul.f32 %v926_v36, %v3232_v6 }
 0x1c8   : > { %4039 = vst [vmem:[#allocation61_spill] sm:$0xff] %v3365_v42  ;;  %v3367_v53 = vpop.f32.mrb[26].mxu0  ;;  %v3369_v9 = vpop.f32.mrb[26].mxu1  ;;  %v769_v29 = vmul.f32 0.5, %v3043_v60  ;;  %v865_v27 = vmul.f32 0.044715, %v3348_v31  ;;  %v3388_v39 = vadd.f32 %v624_v18, %v3026_v34  ;;  %v3391_v14 = vmul.f32 %v925_v30, %v3258_v2 }
 0x1c9   : > { %4040 = vst [vmem:[#allocation62_spill] sm:$0xff] %v3376_v37  ;;  %v3378_v8 = vpop.f32.mrb[27].mxu0  ;;  %v3380_v41 = vpop.f32.mrb[27].mxu1  ;;  %4041 = vst [vmem:[#allocation63_spill] sm:$0xff] %v3383_v48  ;;  %v767_v15 = vmul.f32 0.5, %v3036_v43  ;;  %v771_v11 = vmul.f32 0.5, %v3046_v62  ;;  %v3397_v22 = vmul.f32 %v927_v19, %v3291_v57  ;;  %v3402_v60 = vadd.f32 %v3287_v61, %v3028_v35 }
 0x1ca   : > { %4042 = vst [vmem:[#allocation64_spill] sm:$0xff] %v3391_v14  ;;  %v867_v4 = vmul.f32 0.044715, %v3352_v13  ;;  %v868_v36 = vmul.f32 0.044715, %v3365_v42  ;;  %v1029_v18 = vadd.f32 %v3141_v24, %v3065_v25  ;;  %v3407_v48 = vmul.f32 %v928_v58, %v3314_v47  ;;  %v4046_v19 = vld [vmem:[#allocation33_spill] sm:$0xff] }
 0x1cb   : > { %4043 = vst [vmem:[#allocation65_spill] sm:$0xff] %v3397_v22  ;;  %v2372_v30 = vpop.eup %2371  ;;  %v3410_v43 = vmul.f32 %v930_v51, %v3317_v23  ;;  %v870_v62 = vmul.f32 0.044715, %v3376_v37  ;;  %v1033_v6 = vadd.f32 %v4046_v19, %v3093_v52  ;;  %v929_v61 = vmul.f32 %v865_v27, %v3348_v31 }
 0x1cc   : > { %4044 = vst [vmem:[#allocation66_spill] sm:$0xff] %v3407_v48  ;;  %v2374_v22 = vpop.eup %2373  ;;  %v1213_v57 = vadd.f32 1.0, %v2372_v30  ;;  %v869_v14 = vmul.f32 0.044715, %v3388_v39  ;;  %v3418_v24 = vmul.f32 0.5, %v3065_v25  ;;  %v931_v23 = vmul.f32 %v867_v4, %v3352_v13 }
 0x1cd   : > { %4045 = vst [vmem:[#allocation67_spill] sm:$0xff] %v3410_v43  ;;  %v2376_v51 = vpop.eup %2375  ;;  %v1217_v43 = vadd.f32 1.0, %v2374_v22  ;;  %v1093_v48 = vmul.f32 0.7978845, %v1029_v18  ;;  %v1097_v47 = vmul.f32 0.7978845, %v1033_v6  ;;  %v932_v27 = vmul.f32 %v868_v36, %v3365_v42 }
 0x1ce   : > { %v3420_v2 = vpop.f32.mrb[28].mxu0  ;;  %v3422_v58 = vpop.f32.mrb[28].mxu1  ;;  %v1215_v49 = vadd.f32 1.0, %v2376_v51  ;;  %v871_v26 = vmul.f32 0.044715, %v3402_v60  ;;  %v3430_v25 = vmul.f32 0.5, %v3093_v52  ;;  %v1277_v22 = vmul.f32 %v1213_v57, %v3305_v40 }
 0x1cf   : > { %4047 = vst [vmem:[#allocation33_spill] sm:$0xff] %v3420_v2  ;;  %4048 = vst [vmem:[#allocation68_spill] sm:$0xff] %v3422_v58  ;;  %v3425_v19 = vpop.f32.mrb[29].mxu0  ;;  %v2378_v30 = vpop.eup %2377  ;;  %v1281_v4 = vmul.f32 %v1217_v43, %v769_v29  ;;  %2379 = vtanh.f32 %v1093_v48  ;;  %v934_v36 = vmul.f32 %v870_v62, %v3376_v37  ;;  %v933_v51 = vmul.f32 %v869_v14, %v3388_v39  ;;  %v4052_v52 = vld [vmem:[#allocation18_spill] sm:$0xff]  ;;  %v4054_v40 = vld [vmem:[#allocation21_spill] sm:$0xff] }
 0x1d0   : > { %4049 = vst [vmem:[#allocation69_spill] sm:$0xff] %v3425_v19  ;;  %v3432_v3 = vpop.f32.mrb[29].mxu1  ;;  %v3434_v44 = vpop.f32.mrb[30].mxu0  ;;  %v1219_v18 = vadd.f32 1.0, %v2378_v30  ;;  %2381 = vtanh.f32 %v1097_v47  ;;  %v4053_v19 = vld [vmem:[#allocation29_spill] sm:$0xff]  ;;  %v1279_v2 = vmul.f32 %v1215_v49, %v767_v15  ;;  %v4055_v29 = vld [vmem:[#allocation34_spill] sm:$0xff]  ;;  %v3450_v43 = vmul.f32 %v929_v61, %v3348_v31 }
 0x1d1   : > { %4050 = vst [vmem:[#allocation70_spill] sm:$0xff] %v3432_v3  ;;  %4051 = vst [vmem:[#allocation71_spill] sm:$0xff] %v3434_v44  ;;  %v3437_v6 = vpop.f32.mrb[30].mxu1  ;;  %v3439_v16 = vpop.f32.mrb[31].mxu0  ;;  %v1031_v58 = vadd.f32 %v4053_v19, %v4052_v52  ;;  %v1341_v44 = vpack.c.bf16 %v1281_v4, %v1277_v22  ;;  %v1035_v48 = vadd.f32 %v4055_v29, %v4054_v40  ;;  %v4059_v15 = vld [vmem:[#allocation25_spill] sm:$0xff] }
 0x1d2   : > { %v3445_v3 = vpop.f32.mrb[31].mxu1  ;;  %v1283_v57 = vmul.f32 %v1219_v18, %v771_v11  ;;  %v3453_v30 = vmul.f32 %v931_v23, %v3352_v13  ;;  %v3457_v47 = vadd.f32 %v3297_v54, %v3022_v32  ;;  %v3461_v49 = vadd.f32 %v3299_v56, %v3024_v33  ;;  %v4058_v11 = vld [vmem:[#allocation16_spill] sm:$0xff] }
 0x1d3   : > { %v1095_v62 = vmul.f32 0.7978845, %v1031_v58  ;;  %1667 = vmatprep.mubr.bf16.mxu0 %v1341_v44  ;;  %v1099_v19 = vmul.f32 0.7978845, %v1035_v48  ;;  %v1028_v22 = vadd.f32 %v4059_v15, %v4058_v11  ;;  %v4060_v61 = vpack.c.bf16 %v3334_v50, %v3331_v59  ;;  %v4062_v44 = vld [vmem:[#allocation19_spill] sm:$0xff]  ;;  %v4068_v48 = vld [vmem:[#allocation20_spill] sm:$0xff] }
 0x1d4   : > { %4056 = vst [vmem:[#allocation18_spill] sm:$0xff] %v3457_v47  ;;  %v1343_v14 = vpack.c.bf16 %v1283_v57, %v1279_v2  ;;  %4057 = vst [vmem:[#allocation29_spill] sm:$0xff] %v3461_v49  ;;  %v3469_v23 = vmul.f32 %v932_v27, %v3365_v42  ;;  %v935_v54 = vmul.f32 %v871_v26, %v3402_v60  ;;  %v4063_v2 = vld [vmem:[#allocation30_spill] sm:$0xff]  ;;  %v872_v50 = vmul.f32 0.044715, %v3457_v47  ;;  %v4066_v27 = vld [vmem:[#allocation17_spill] sm:$0xff] }
 0x1d5   : > { %1668 = vmatmul.mubr.bf16.vlgmr.msra.gmra.mrb[32].mxu0 %v4060_v61  ;;  %2383 = vtanh.f32 %v1095_v62  ;;  %v1032_v58 = vadd.f32 %v4063_v2, %v4062_v44  ;;  %v3475_v56 = vmul.f32 %v934_v36, %v3376_v37  ;;  %v3478_v4 = vmul.f32 %v933_v51, %v3388_v39  ;;  %v4067_v57 = vld [vmem:[#allocation26_spill] sm:$0xff]  ;;  %v4069_v62 = vld [vmem:[#allocation31_spill] sm:$0xff] }
 0x1d6   : > { %4061 = vst [vmem:[#allocation21_spill] sm:$0xff] %v3469_v23  ;;  %1764 = vmatprep.mubr.bf16.mxu1 %v1343_v14  ;;  %2385 = vtanh.f32 %v1099_v19  ;;  %v1092_v18 = vmul.f32 0.7978845, %v1028_v22  ;;  %v4065_v59 = vpack.c.bf16 %v3344_v5, %v3341_v17  ;;  %v1030_v29 = vadd.f32 %v4067_v57, %v4066_v27 }
 0x1d7   : > { %4064 = vst [vmem:[#allocation34_spill] sm:$0xff] %v3475_v56  ;;  %v1096_v26 = vmul.f32 0.7978845, %v1032_v58  ;;  %v1034_v14 = vadd.f32 %v4069_v62, %v4068_v48  ;;  %v874_v36 = vmul.f32 0.044715, %v3461_v49  ;;  %v3491_v51 = vadd.f32 %v3309_v10, %v3026_v34 }
 0x1d8   : > { %1765 = vmatmul.mubr.bf16.vlgmr.msra.gmra.mrb[32].mxu1 %v4065_v59  ;;  %2387 = vtanh.f32 %v1092_v18  ;;  %v3495_v17 = vadd.f32 %v3311_v1, %v3028_v35  ;;  %v3498_v5 = vmul.f32 %v935_v54, %v3402_v60  ;;  %v1094_v19 = vmul.f32 0.7978845, %v1030_v29 }
 0x1d9   : > { %2389 = vtanh.f32 %v1096_v26  ;;  %v1098_v15 = vmul.f32 0.7978845, %v1034_v14  ;;  %v2380_v22 = vpop.eup %2379  ;;  %v775_v61 = vmul.f32 0.5, %v4052_v52  ;;  %v873_v2 = vmul.f32 0.044715, %v3491_v51 }
 0x1da   : > { %v875_v58 = vmul.f32 0.044715, %v3495_v17  ;;  %v3505_v10 = vadd.f32 %v3336_v12, %v3022_v32  ;;  %v2382_v18 = vpop.eup %2381  ;;  %v1221_v1 = vadd.f32 1.0, %v2380_v22  ;;  %v779_v59 = vmul.f32 0.5, %v4054_v40 }
 0x1db   : > { %2391 = vtanh.f32 %v1094_v19  ;;  %v3510_v54 = vadd.f32 %v3338_v55, %v3024_v33  ;;  %v1225_v26 = vadd.f32 1.0, %v2382_v18  ;;  %v936_v52 = vmul.f32 %v872_v50, %v3457_v47 }
 0x1dc   : > { %v938_v57 = vmul.f32 %v874_v36, %v3461_v49  ;;  %2393 = vtanh.f32 %v1098_v15  ;;  %v772_v29 = vmul.f32 0.5, %v4058_v11  ;;  %v937_v12 = vmul.f32 %v873_v2, %v3491_v51 }
 0x1dd   : > { %4070 = vst [vmem:[#allocation16_spill] sm:$0xff] %v3510_v54  ;;  %v939_v62 = vmul.f32 %v875_v58, %v3495_v17  ;;  %v3519_v40 = vadd.f32 %v3354_v28, %v3026_v34  ;;  %v1285_v14 = vmul.f32 %v1221_v1, %v3418_v24  ;;  %v1289_v55 = vmul.f32 %v1225_v26, %v3430_v25 }
 0x1de   : > { %v876_v19 = vmul.f32 0.044715, %v3505_v10  ;;  %v3526_v50 = vadd.f32 %v3356_v0, %v3028_v35  ;;  %v776_v11 = vmul.f32 0.5, %v4062_v44  ;;  %v774_v15 = vmul.f32 0.5, %v4066_v27 }
 0x1df   : > { %v2384_v36 = vpop.eup %2383  ;;  %v778_v22 = vmul.f32 0.5, %v4068_v48  ;;  %v878_v28 = vmul.f32 0.044715, %v3510_v54  ;;  %v1345_v58 = vpack.c.bf16 %v1289_v55, %v1285_v14  ;;  %v3533_v25 = vmul.f32 %v936_v52, %v3457_v47  ;;  %v4074_v52 = vld [vmem:[#allocation24_spill] sm:$0xff]  ;;  %v4075_v55 = vld [vmem:[#allocation38_spill] sm:$0xff] }
 0x1e0   : > { %v2386_v2 = vpop.eup %2385  ;;  %v1223_v24 = vadd.f32 1.0, %v2384_v36  ;;  %v3536_v18 = vmul.f32 %v938_v57, %v3461_v49  ;;  %v3539_v1 = vmul.f32 %v937_v12, %v3491_v51  ;;  %v3542_v44 = vmul.f32 %v939_v62, %v3495_v17  ;;  %v4077_v47 = vld [vmem:[#allocation46_spill] sm:$0xff] }
 0x1e1   : > { %4071 = vst [vmem:[#allocation25_spill] sm:$0xff] %v3533_v25  ;;  %v1227_v0 = vadd.f32 1.0, %v2386_v2  ;;  %v877_v27 = vmul.f32 0.044715, %v3519_v40  ;;  %1675 = vmatprep.mubr.bf16.mxu0 %v1345_v58  ;;  %v940_v26 = vmul.f32 %v876_v19, %v3505_v10  ;;  %v879_v14 = vmul.f32 0.044715, %v3526_v50 }
 0x1e2   : > { %4072 = vst [vmem:[#allocation19_spill] sm:$0xff] %v3536_v18  ;;  %4073 = vst [vmem:[#allocation30_spill] sm:$0xff] %v3542_v44  ;;  %v2388_v48 = vpop.eup %2387  ;;  %v1037_v36 = vadd.f32 %v4075_v55, %v4074_v52  ;;  %v1041_v57 = vadd.f32 %v3255_v7, %v3148_v45  ;;  %v1287_v12 = vmul.f32 %v1223_v24, %v775_v61  ;;  %v4076_v58 = vld [vmem:[#allocation27_spill] sm:$0xff] }
 0x1e3   : > { %v2390_v2 = vpop.eup %2389  ;;  %v1291_v18 = vmul.f32 %v1227_v0, %v779_v59  ;;  %v1220_v49 = vadd.f32 1.0, %v2388_v48  ;;  %v942_v62 = vmul.f32 %v878_v28, %v3510_v54  ;;  %v1039_v19 = vadd.f32 %v4077_v47, %v4076_v58 }
 0x1e4   : > { %v1224_v56 = vadd.f32 1.0, %v2390_v2  ;;  %v1101_v37 = vmul.f32 0.7978845, %v1037_v36  ;;  %v1105_v25 = vmul.f32 0.7978845, %v1041_v57  ;;  %v1043_v55 = vadd.f32 %v3261_v38, %v3151_v46  ;;  %v4083_v36 = vld [vmem:[#allocation23_spill] sm:$0xff] }
 0x1e5   : > { %v2392_v23 = vpop.eup %2391  ;;  %v1347_v42 = vpack.c.bf16 %v1291_v18, %v1287_v12  ;;  %v1284_v44 = vmul.f32 %v1220_v49, %v772_v29  ;;  %v3558_v7 = vadd.f32 %v3367_v53, %v3022_v32  ;;  %v1103_v28 = vmul.f32 0.7978845, %v1039_v19  ;;  %v4084_v57 = vld [vmem:[#allocation37_spill] sm:$0xff] }
 0x1e6   : > { %v2394_v61 = vpop.eup %2393  ;;  %v1288_v59 = vmul.f32 %v1224_v56, %v776_v11  ;;  %v1222_v24 = vadd.f32 1.0, %v2392_v23  ;;  %2395 = vtanh.f32 %v1101_v37  ;;  %v941_v48 = vmul.f32 %v877_v27, %v3519_v40  ;;  %v4080_v56 = vld [vmem:[#allocation22_spill] sm:$0xff]  ;;  %v4081_v11 = vld [vmem:[#allocation36_spill] sm:$0xff] }
 0x1e7   : > { %4078 = vst [vmem:[#allocation17_spill] sm:$0xff] %v3558_v7  ;;  %1772 = vmatprep.mubr.bf16.mxu1 %v1347_v42  ;;  %v1226_v0 = vadd.f32 1.0, %v2394_v61  ;;  %2397 = vtanh.f32 %v1105_v25  ;;  %v1107_v47 = vmul.f32 0.7978845, %v1043_v55  ;;  %v943_v49 = vmul.f32 %v879_v14, %v3526_v50 }
 0x1e8   : > { %v1344_v18 = vpack.c.bf16 %v1288_v59, %v1284_v44  ;;  %v781_v38 = vmul.f32 0.5, %v4074_v52  ;;  %2399 = vtanh.f32 %v1103_v28  ;;  %v1286_v29 = vmul.f32 %v1222_v24, %v774_v15  ;;  %v4086_v28 = vld [vmem:[#allocation33_spill] sm:$0xff] }
 0x1e9   : > { %v1290_v53 = vmul.f32 %v1226_v0, %v778_v22  ;;  %2401 = vtanh.f32 %v1107_v47  ;;  %v3565_v23 = vadd.f32 %v3369_v9, %v3024_v33  ;;  %v785_v42 = vmul.f32 0.5, %v3148_v45 }
 0x1ea   : > { %1676 = vmatmul.mubr.bf16.gmra.mrb[36].mxu0 %v1344_v18  ;;  %v880_v37 = vmul.f32 0.044715, %v3558_v7  ;;  %v1036_v25 = vadd.f32 %v4081_v11, %v4080_v56  ;;  %v1040_v44 = vadd.f32 %v3249_v63, %v3135_v20  ;;  %v3574_v15 = vmul.f32 %v940_v26, %v3505_v10  ;;  %v4085_v26 = vld [vmem:[#allocation47_spill] sm:$0xff] }
 0x1eb   : > { %4079 = vst [vmem:[#allocation26_spill] sm:$0xff] %v3565_v23  ;;  %v1346_v27 = vpack.c.bf16 %v1290_v53, %v1286_v29  ;;  %v3577_v22 = vmul.f32 %v942_v62, %v3510_v54  ;;  %v3580_v9 = vmul.f32 %v941_v48, %v3519_v40  ;;  %v3583_v45 = vmul.f32 %v943_v49, %v3526_v50  ;;  %v4087_v48 = vld [vmem:[#allocation68_spill] sm:$0xff] }
 0x1ec   : > { %v1100_v14 = vmul.f32 0.7978845, %v1036_v25  ;;  %v1104_v52 = vmul.f32 0.7978845, %v1040_v44  ;;  %v1038_v2 = vadd.f32 %v4084_v57, %v4083_v36  ;;  %v882_v63 = vmul.f32 0.044715, %v3565_v23 }
 0x1ed   : > { %4082 = vst [vmem:[#allocation20_spill] sm:$0xff] %v3577_v22  ;;  %1773 = vmatmul.mubr.bf16.gmra.mrb[36].mxu1 %v1346_v27  ;;  %v1042_v12 = vadd.f32 %v4085_v26, %v3138_v21  ;;  %v3592_v62 = vadd.f32 %v3378_v8, %v3026_v34  ;;  %v3596_v19 = vadd.f32 %v3380_v41, %v3028_v35  ;;  %v783_v55 = vmul.f32 0.5, %v4076_v58 }
 0x1ee   : > { %v944_v61 = vmul.f32 %v880_v37, %v3558_v7  ;;  %2403 = vtanh.f32 %v1100_v14  ;;  %v1102_v59 = vmul.f32 0.7978845, %v1038_v2  ;;  %v3602_v0 = vadd.f32 %v4086_v28, %v3022_v32  ;;  %v4089_v2 = vld [vmem:[#allocation69_spill] sm:$0xff]  ;;  %v4091_v28 = vld [vmem:[#allocation70_spill] sm:$0xff] }
 0x1ef   : > { %2405 = vtanh.f32 %v1104_v52  ;;  %v1106_v24 = vmul.f32 0.7978845, %v1042_v12  ;;  %v3606_v8 = vadd.f32 %v4087_v48, %v3024_v33  ;;  %v787_v41 = vmul.f32 0.5, %v3151_v46 }
 0x1f0   : > { %v2396_v47 = vpop.eup %2395  ;;  %v780_v18 = vmul.f32 0.5, %v4080_v56  ;;  %2407 = vtanh.f32 %v1102_v59  ;;  %v881_v58 = vmul.f32 0.044715, %v3592_v62  ;;  %v946_v53 = vmul.f32 %v882_v63, %v3565_v23 }
 0x1f1   : > { %v2398_v49 = vpop.eup %2397  ;;  %v1229_v29 = vadd.f32 1.0, %v2396_v47  ;;  %2409 = vtanh.f32 %v1106_v24  ;;  %v883_v37 = vmul.f32 0.044715, %v3596_v19  ;;  %v3614_v44 = vmul.f32 %v944_v61, %v3558_v7 }
 0x1f2   : > { %v2400_v11 = vpop.eup %2399  ;;  %v1233_v25 = vadd.f32 1.0, %v2398_v49  ;;  %v784_v27 = vmul.f32 0.5, %v3135_v20  ;;  %v782_v46 = vmul.f32 0.5, %v4083_v36  ;;  %v884_v52 = vmul.f32 0.044715, %v3602_v0 }
 0x1f3   : > { %4088 = vst [vmem:[#allocation31_spill] sm:$0xff] %v3614_v44  ;;  %v2402_v56 = vpop.eup %2401  ;;  %v1231_v14 = vadd.f32 1.0, %v2400_v11  ;;  %v886_v57 = vmul.f32 0.044715, %v3606_v8  ;;  %v3622_v63 = vadd.f32 %v4089_v2, %v3026_v34  ;;  %v1293_v26 = vmul.f32 %v1229_v29, %v781_v38  ;;  %v4092_v2 = vld [vmem:[#allocation35_spill] sm:$0xff] }
 0x1f4   : > { %v1297_v12 = vmul.f32 %v1233_v25, %v785_v42  ;;  %v1235_v59 = vadd.f32 1.0, %v2402_v56  ;;  %v945_v61 = vmul.f32 %v881_v58, %v3592_v62  ;;  %v3626_v24 = vmul.f32 %v946_v53, %v3565_v23  ;;  %v4093_v38 = vld [vmem:[#allocation51_spill] sm:$0xff]  ;;  %v4094_v25 = vld [vmem:[#allocation42_spill] sm:$0xff] }
 0x1f5   : > { %v786_v20 = vmul.f32 0.5, %v3138_v21  ;;  %v947_v36 = vmul.f32 %v883_v37, %v3596_v19  ;;  %v3632_v48 = vadd.f32 %v4091_v28, %v3028_v35  ;;  %v1295_v49 = vmul.f32 %v1231_v14, %v783_v55  ;;  %v4095_v21 = vld [vmem:[#allocation56_spill] sm:$0xff]  ;;  %v4099_v23 = vld [vmem:[#allocation59_spill] sm:$0xff] }
 0x1f6   : > { %4090 = vst [vmem:[#allocation24_spill] sm:$0xff] %v3626_v24  ;;  %v1349_v47 = vpack.c.bf16 %v1297_v12, %v1293_v26  ;;  %v1299_v11 = vmul.f32 %v1235_v59, %v787_v41  ;;  %v1045_v42 = vadd.f32 %v4093_v38, %v4092_v2  ;;  %v948_v29 = vmul.f32 %v884_v52, %v3602_v0  ;;  %v4096_v41 = vld [vmem:[#allocation39_spill] sm:$0xff]  ;;  %v4097_v14 = vld [vmem:[#allocation52_spill] sm:$0xff] }
 0x1f7   : > { %v950_v58 = vmul.f32 %v886_v57, %v3606_v8  ;;  %v885_v53 = vmul.f32 0.044715, %v3622_v63  ;;  %v1049_v56 = vadd.f32 %v4095_v21, %v4094_v25  ;;  %v3642_v28 = vmul.f32 %v945_v61, %v3592_v62  ;;  %v4098_v38 = vld [vmem:[#allocation43_spill] sm:$0xff] }
 0x1f8   : > { %v2404_v37 = vpop.eup %2403  ;;  %1683 = vmatprep.mubr.bf16.mxu0 %v1349_v47  ;;  %v1351_v24 = vpack.c.bf16 %v1299_v11, %v1295_v49  ;;  %v1109_v55 = vmul.f32 0.7978845, %v1045_v42  ;;  %v1047_v26 = vadd.f32 %v4097_v14, %v4096_v41  ;;  %v887_v52 = vmul.f32 0.044715, %v3632_v48 }
 0x1f9   : > { %v2406_v12 = vpop.eup %2405  ;;  %v1228_v59 = vadd.f32 1.0, %v2404_v37  ;;  %v1113_v57 = vmul.f32 0.7978845, %v1049_v56  ;;  %v1051_v22 = vadd.f32 %v4099_v23, %v4098_v38  ;;  %v3650_v47 = vmul.f32 %v947_v36, %v3596_v19  ;;  %v4100_v37 = vld [vmem:[#allocation71_spill] sm:$0xff] }
 0x1fa   : > { %v2408_v54 = vpop.eup %2407  ;;  %1780 = vmatprep.mubr.bf16.mxu1 %v1351_v24  ;;  %v1232_v21 = vadd.f32 1.0, %v2406_v12  ;;  %2411 = vtanh.f32 %v1109_v55  ;;  %v1111_v61 = vmul.f32 0.7978845, %v1047_v26  ;;  %v3654_v14 = vadd.f32 %v4100_v37, %v3022_v32  ;;  %v4103_v12 = vld [vmem:[#allocation49_spill] sm:$0xff]  ;;  %v4109_v37 = vld [vmem:[#allocation54_spill] sm:$0xff] }
 0x1fb   : > { %v2410_v49 = vpop.eup %2409  ;;  %v1292_v11 = vmul.f32 %v1228_v59, %v780_v18  ;;  %v1230_v42 = vadd.f32 1.0, %v2408_v54  ;;  %2413 = vtanh.f32 %v1113_v57  ;;  %v1115_v7 = vmul.f32 0.7978845, %v1051_v22  ;;  %v4102_v22 = vld [vmem:[#allocation28_spill] sm:$0xff]  ;;  %v4105_v57 = vld [vmem:[#allocation53_spill] sm:$0xff] }
 0x1fc   : > { %v1296_v56 = vmul.f32 %v1232_v21, %v784_v27  ;;  %v1234_v44 = vadd.f32 1.0, %v2410_v49  ;;  %2415 = vtanh.f32 %v1111_v61  ;;  %v3657_v23 = vmul.f32 %v948_v29, %v3602_v0  ;;  %v4104_v29 = vld [vmem:[#allocation40_spill] sm:$0xff] }
 0x1fd   : > { %v3660_v24 = vmul.f32 %v950_v58, %v3606_v8  ;;  %v949_v36 = vmul.f32 %v885_v53, %v3622_v63  ;;  %v951_v18 = vmul.f32 %v887_v52, %v3632_v48  ;;  %v1294_v55 = vmul.f32 %v1230_v42, %v782_v46  ;;  %v4108_v42 = vld [vmem:[#allocation41_spill] sm:$0xff] }
 0x1fe   : > { %v1348_v54 = vpack.c.bf16 %v1296_v56, %v1292_v11  ;;  %v1298_v26 = vmul.f32 %v1234_v44, %v786_v20  ;;  %2417 = vtanh.f32 %v1115_v7  ;;  %v789_v32 = vmul.f32 0.5, %v4092_v2  ;;  %v4106_v44 = vld [vmem:[#allocation32_spill] sm:$0xff]  ;;  %v4107_v7 = vld [vmem:[#allocation50_spill] sm:$0xff] }
 0x1ff   : > { %4101 = vst [vmem:[#allocation38_spill] sm:$0xff] %v3660_v24  ;;  %v888_v27 = vmul.f32 0.044715, %v3654_v14  ;;  %v1044_v59 = vadd.f32 %v4103_v12, %v4102_v22  ;;  %v1048_v21 = vadd.f32 %v4105_v57, %v4104_v29  ;;  %v793_v53 = vmul.f32 0.5, %v4094_v25  ;;  %v4121_v24 = vld [vmem:[#allocation67_spill] sm:$0xff] }
 0x200   : > { %1684 = vmatmul.mubr.bf16.gmra.mrb[40].mxu0 %v1348_v54  ;;  %v1350_v58 = vpack.c.bf16 %v1298_v26, %v1294_v55  ;;  %v3673_v52 = vadd.f32 %v3437_v6, %v3024_v33  ;;  %v1046_v46 = vadd.f32 %v4107_v7, %v4106_v44  ;;  %v3678_v20 = vmul.f32 %v949_v36, %v3622_v63 }
 0x201   : > { %v791_v2 = vmul.f32 0.5, %v4096_v41  ;;  %v1108_v61 = vmul.f32 0.7978845, %v1044_v59  ;;  %v1112_v49 = vmul.f32 0.7978845, %v1048_v21  ;;  %v3682_v11 = vmul.f32 %v951_v18, %v3632_v48  ;;  %v4111_v59 = vld [vmem:[#allocation64_spill] sm:$0xff] }
 0x202   : > { %1781 = vmatmul.mubr.bf16.gmra.mrb[40].mxu1 %v1350_v58  ;;  %v795_v25 = vmul.f32 0.5, %v4098_v38  ;;  %v1050_v33 = vadd.f32 %v4109_v37, %v4108_v42  ;;  %v1110_v6 = vmul.f32 0.7978845, %v1046_v46  ;;  %v952_v56 = vmul.f32 %v888_v27, %v3654_v14  ;;  %v4110_v27 = vld [vmem:[#allocation48_spill] sm:$0xff] }
 0x203   : > { %v3689_v54 = vmul.f32 0.5, %v4102_v22  ;;  %v3692_v36 = vmul.f32 0.5, %v4104_v29  ;;  %2419 = vtanh.f32 %v1108_v61  ;;  %v890_v55 = vmul.f32 0.044715, %v3673_v52 }
 0x204   : > { %v2412_v41 = vpop.eup %2411  ;;  %2421 = vtanh.f32 %v1112_v49  ;;  %v1114_v18 = vmul.f32 0.7978845, %v1050_v33  ;;  %v3697_v38 = vadd.f32 %v3439_v16, %v3026_v34  ;;  %v1053_v22 = vadd.f32 %v4111_v59, %v4110_v27  ;;  %v4114_v59 = vld [vmem:[#allocation44_spill] sm:$0xff] }
 0x205   : > { %v2414_v26 = vpop.eup %2413  ;;  %v1237_v12 = vadd.f32 1.0, %v2412_v41  ;;  %2423 = vtanh.f32 %v1110_v6  ;;  %v1057_v29 = vadd.f32 %v3450_v43, %v3348_v31  ;;  %v790_v58 = vmul.f32 0.5, %v4106_v44 }
 0x206   : > { %v2416_v57 = vpop.eup %2415  ;;  %v1241_v21 = vadd.f32 1.0, %v2414_v26  ;;  %v794_v7 = vmul.f32 0.5, %v4108_v42  ;;  %2425 = vtanh.f32 %v1114_v18  ;;  %v3707_v34 = vadd.f32 %v3445_v3, %v3028_v35  ;;  %v4112_v35 = vld [vmem:[#allocation55_spill] sm:$0xff]  ;;  %v4113_v3 = vld [vmem:[#allocation65_spill] sm:$0xff] }
 0x207   : > { %v1239_v46 = vadd.f32 1.0, %v2416_v57  ;;  %v1117_v16 = vmul.f32 0.7978845, %v1053_v22  ;;  %v1121_v61 = vmul.f32 0.7978845, %v1057_v29  ;;  %v1301_v37 = vmul.f32 %v1237_v12, %v789_v32  ;;  %v4115_v22 = vld [vmem:[#allocation60_spill] sm:$0xff] }
 0x208   : > { %v2418_v49 = vpop.eup %2417  ;;  %v1305_v33 = vmul.f32 %v1241_v21, %v793_v53  ;;  %v3710_v6 = vmul.f32 %v952_v56, %v3654_v14  ;;  %v889_v43 = vmul.f32 0.044715, %v3697_v38  ;;  %v3714_v44 = vmul.f32 %v890_v55, %v3673_v52  ;;  %v4116_v21 = vld [vmem:[#allocation57_spill] sm:$0xff] }
 0x209   : > { %v1243_v41 = vadd.f32 1.0, %v2418_v49  ;;  %v797_v42 = vmul.f32 0.5, %v4110_v27  ;;  %2427 = vtanh.f32 %v1117_v16  ;;  %v1055_v26 = vadd.f32 %v4113_v3, %v4112_v35  ;;  %v4117_v16 = vld [vmem:[#allocation66_spill] sm:$0xff] }
 0x20a   : > { %v1353_v18 = vpack.c.bf16 %v1305_v33, %v1301_v37  ;;  %2429 = vtanh.f32 %v1121_v61  ;;  %v1059_v32 = vadd.f32 %v3453_v30, %v3352_v13  ;;  %v1303_v53 = vmul.f32 %v1239_v46, %v791_v2  ;;  %v4118_v2 = vld [vmem:[#allocation45_spill] sm:$0xff] }
 0x20b   : > { %v1307_v56 = vmul.f32 %v1243_v41, %v795_v25  ;;  %v891_v12 = vmul.f32 0.044715, %v3707_v34  ;;  %v1052_v29 = vadd.f32 %v4115_v22, %v4114_v59  ;;  %v953_v55 = vmul.f32 %v889_v43, %v3697_v38  ;;  %v4119_v25 = vld [vmem:[#allocation63_spill] sm:$0xff] }
 0x20c   : > { %1691 = vmatprep.mubr.bf16.mxu0 %v1353_v18  ;;  %v1119_v27 = vmul.f32 0.7978845, %v1055_v26  ;;  %v1123_v57 = vmul.f32 0.7978845, %v1059_v32  ;;  %v1056_v61 = vadd.f32 %v4117_v16, %v4116_v21  ;;  %v801_v33 = vmul.f32 0.5, %v3348_v31  ;;  %v4120_v18 = vld [vmem:[#allocation58_spill] sm:$0xff] }
 0x20d   : > { %v2420_v49 = vpop.eup %2419  ;;  %v1355_v37 = vpack.c.bf16 %v1307_v56, %v1303_v53  ;;  %v1116_v30 = vmul.f32 0.7978845, %v1052_v29  ;;  %v1054_v46 = vadd.f32 %v4119_v25, %v4118_v2  ;;  %v1058_v43 = vadd.f32 %v4121_v24, %v4120_v18 }
 0x20e   : > { %v2422_v41 = vpop.eup %2421  ;;  %v1236_v3 = vadd.f32 1.0, %v2420_v49  ;;  %2431 = vtanh.f32 %v1119_v27  ;;  %v1120_v22 = vmul.f32 0.7978845, %v1056_v61  ;;  %v3733_v16 = vmul.f32 %v891_v12, %v3707_v34 }
 0x20f   : > { %v2424_v26 = vpop.eup %2423  ;;  %1788 = vmatprep.mubr.bf16.mxu1 %v1355_v37  ;;  %v1240_v32 = vadd.f32 1.0, %v2422_v41  ;;  %2433 = vtanh.f32 %v1123_v57  ;;  %v1118_v53 = vmul.f32 0.7978845, %v1054_v46  ;;  %v3736_v29 = vmul.f32 %v953_v55, %v3697_v38 }
 0x210   : > { %v2426_v31 = vpop.eup %2425  ;;  %v1238_v56 = vadd.f32 1.0, %v2424_v26  ;;  %2435 = vtanh.f32 %v1116_v30  ;;  %v1122_v49 = vmul.f32 0.7978845, %v1058_v43  ;;  %v1300_v27 = vmul.f32 %v1236_v3, %v3689_v54  ;;  %v4122_v26 = vld [vmem:[#allocation30_spill] sm:$0xff] }
 0x211   : > { %v1304_v61 = vmul.f32 %v1240_v32, %v3692_v36  ;;  %v1242_v24 = vadd.f32 1.0, %v2426_v31  ;;  %2437 = vtanh.f32 %v1120_v22  ;;  %v799_v37 = vmul.f32 0.5, %v4112_v35 }
 0x212   : > { %2439 = vtanh.f32 %v1118_v53  ;;  %v1061_v12 = vadd.f32 %v3478_v4, %v3388_v39  ;;  %v1065_v57 = vadd.f32 %v3539_v1, %v3491_v51  ;;  %v1302_v46 = vmul.f32 %v1238_v56, %v790_v58 }
 0x213   : > { %v2428_v25 = vpop.eup %2427  ;;  %v1352_v55 = vpack.c.bf16 %v1304_v61, %v1300_v27  ;;  %v1306_v30 = vmul.f32 %v1242_v24, %v794_v7  ;;  %2441 = vtanh.f32 %v1122_v49  ;;  %v803_v36 = vmul.f32 0.5, %v3352_v13  ;;  %v4124_v61 = vld [vmem:[#allocation21_spill] sm:$0xff] }
 0x214   : > { %v2430_v41 = vpop.eup %2429  ;;  %v1245_v54 = vadd.f32 1.0, %v2428_v25  ;;  %v1125_v3 = vmul.f32 0.7978845, %v1061_v12  ;;  %v1129_v22 = vmul.f32 0.7978845, %v1065_v57  ;;  %v1063_v4 = vadd.f32 %v3498_v5, %v3402_v60  ;;  %v4123_v5 = vld [vmem:[#allocation61_spill] sm:$0xff] }
 0x215   : > { %1692 = vmatmul.mubr.bf16.gmra.mrb[44].mxu0 %v1352_v55  ;;  %v1354_v35 = vpack.c.bf16 %v1306_v30, %v1302_v46  ;;  %v1249_v43 = vadd.f32 1.0, %v2430_v41  ;;  %v1067_v1 = vadd.f32 %v4122_v26, %v3495_v17  ;;  %v796_v58 = vmul.f32 0.5, %v4114_v59  ;;  %v4125_v12 = vld [vmem:[#allocation18_spill] sm:$0xff] }
 0x216   : > { %v1309_v32 = vmul.f32 %v1245_v54, %v797_v42  ;;  %v800_v7 = vmul.f32 0.5, %v4116_v21  ;;  %2443 = vtanh.f32 %v1125_v3  ;;  %v1127_v13 = vmul.f32 0.7978845, %v1063_v4  ;;  %v4126_v42 = vld [vmem:[#allocation25_spill] sm:$0xff]  ;;  %v4127_v55 = vld [vmem:[#allocation62_spill] sm:$0xff] }
 0x217   : > { %1789 = vmatmul.mubr.bf16.gmra.mrb[44].mxu1 %v1354_v35  ;;  %v1313_v53 = vmul.f32 %v1249_v43, %v801_v33  ;;  %2445 = vtanh.f32 %v1129_v22  ;;  %v1131_v31 = vmul.f32 0.7978845, %v1067_v1  ;;  %v798_v49 = vmul.f32 0.5, %v4118_v2  ;;  %v4128_v33 = vld [vmem:[#allocation34_spill] sm:$0xff]  ;;  %v4129_v35 = vld [vmem:[#allocation29_spill] sm:$0xff]  ;;  %v4130_v43 = vld [vmem:[#allocation19_spill] sm:$0xff] }
 0x218   : > { %v2432_v56 = vpop.eup %2431  ;;  %v802_v27 = vmul.f32 0.5, %v4120_v18  ;;  %v1060_v24 = vadd.f32 %v4124_v61, %v4123_v5  ;;  %v1064_v57 = vadd.f32 %v4126_v42, %v4125_v12  ;;  %2447 = vtanh.f32 %v1127_v13 }
 0x219   : > { %v2434_v59 = vpop.eup %2433  ;;  %v1357_v25 = vpack.c.bf16 %v1313_v53, %v1309_v32  ;;  %v1247_v21 = vadd.f32 1.0, %v2432_v56  ;;  %v1062_v46 = vadd.f32 %v4128_v33, %v4127_v55  ;;  %2449 = vtanh.f32 %v1131_v31 }
 0x21a   : > { %v2436_v30 = vpop.eup %2435  ;;  %v1251_v41 = vadd.f32 1.0, %v2434_v59  ;;  %v1124_v54 = vmul.f32 0.7978845, %v1060_v24  ;;  %v1128_v2 = vmul.f32 0.7978845, %v1064_v57  ;;  %v805_v22 = vmul.f32 0.5, %v3388_v39 }
 0x21b   : > { %v2438_v3 = vpop.eup %2437  ;;  %1699 = vmatprep.mubr.bf16.mxu0 %v1357_v25  ;;  %v1244_v18 = vadd.f32 1.0, %v2436_v30  ;;  %v1066_v4 = vadd.f32 %v4130_v43, %v4129_v35  ;;  %v1126_v26 = vmul.f32 0.7978845, %v1062_v46  ;;  %v1311_v32 = vmul.f32 %v1247_v21, %v799_v37 }
 0x21c   : > { %v2440_v1 = vpop.eup %2439  ;;  %v1315_v53 = vmul.f32 %v1251_v41, %v803_v36  ;;  %v1248_v13 = vadd.f32 1.0, %v2438_v3  ;;  %2451 = vtanh.f32 %v1124_v54  ;;  %v809_v39 = vmul.f32 0.5, %v3491_v51 }
 0x21d   : > { %v2442_v56 = vpop.eup %2441  ;;  %v1308_v61 = vmul.f32 %v1244_v18, %v796_v58  ;;  %v1246_v42 = vadd.f32 1.0, %v2440_v1  ;;  %2453 = vtanh.f32 %v1128_v2  ;;  %v1130_v31 = vmul.f32 0.7978845, %v1066_v4 }
 0x21e   : > { %v1359_v24 = vpack.c.bf16 %v1315_v53, %v1311_v32  ;;  %v1312_v57 = vmul.f32 %v1248_v13, %v800_v7  ;;  %v1250_v59 = vadd.f32 1.0, %v2442_v56  ;;  %2455 = vtanh.f32 %v1126_v26  ;;  %v4132_v13 = vld [vmem:[#allocation31_spill] sm:$0xff] }
 0x21f   : > { %v807_v25 = vmul.f32 0.5, %v3402_v60  ;;  %2457 = vtanh.f32 %v1130_v31  ;;  %v1069_v37 = vadd.f32 %v3580_v9, %v3519_v40  ;;  %v1310_v33 = vmul.f32 %v1246_v42, %v798_v49 }
 0x220   : > { %v2444_v36 = vpop.eup %2443  ;;  %1796 = vmatprep.mubr.bf16.mxu1 %v1359_v24  ;;  %v1356_v21 = vpack.c.bf16 %v1312_v57, %v1308_v61  ;;  %v1314_v58 = vmul.f32 %v1250_v59, %v802_v27  ;;  %v1073_v46 = vadd.f32 %v3642_v28, %v3592_v62  ;;  %v811_v41 = vmul.f32 0.5, %v3495_v17 }
 0x221   : > { %v2446_v30 = vpop.eup %2445  ;;  %v1253_v7 = vadd.f32 1.0, %v2444_v36  ;;  %v1133_v54 = vmul.f32 0.7978845, %v1069_v37  ;;  %v1071_v60 = vadd.f32 %v3583_v45, %v3526_v50  ;;  %v1075_v3 = vadd.f32 %v3650_v47, %v3596_v19  ;;  %v4134_v36 = vld [vmem:[#allocation20_spill] sm:$0xff] }
 0x222   : > { %1700 = vmatmul.mubr.bf16.gmra.mrb[48].mxu0 %v1356_v21  ;;  %v1358_v51 = vpack.c.bf16 %v1314_v58, %v1310_v33  ;;  %v1257_v2 = vadd.f32 1.0, %v2446_v30  ;;  %v1137_v9 = vmul.f32 0.7978845, %v1073_v46  ;;  %v2448_v49 = vpop.eup %2447  ;;  %v804_v18 = vmul.f32 0.5, %v4123_v5  ;;  %v4131_v5 = vld [vmem:[#allocation17_spill] sm:$0xff] }
 0x223   : > { %v1317_v27 = vmul.f32 %v1253_v7, %v805_v22  ;;  %2459 = vtanh.f32 %v1133_v54  ;;  %v1135_v28 = vmul.f32 0.7978845, %v1071_v60  ;;  %v2450_v43 = vpop.eup %2449  ;;  %v1255_v4 = vadd.f32 1.0, %v2448_v49 }
 0x224   : > { %1797 = vmatmul.mubr.bf16.gmra.mrb[48].mxu1 %v1358_v51  ;;  %v1321_v17 = vmul.f32 %v1257_v2, %v809_v39  ;;  %2461 = vtanh.f32 %v1137_v9  ;;  %v1139_v26 = vmul.f32 0.7978845, %v1075_v3  ;;  %v1259_v45 = vadd.f32 1.0, %v2450_v43 }
 0x225   : > { %v808_v1 = vmul.f32 0.5, %v4125_v12  ;;  %2463 = vtanh.f32 %v1135_v28  ;;  %v1068_v32 = vadd.f32 %v3574_v15, %v3505_v10  ;;  %v806_v22 = vmul.f32 0.5, %v4127_v55  ;;  %v4133_v15 = vld [vmem:[#allocation16_spill] sm:$0xff] }
 0x226   : > { %v2452_v47 = vpop.eup %2451  ;;  %v1361_v53 = vpack.c.bf16 %v1321_v17, %v1317_v27  ;;  %2465 = vtanh.f32 %v1139_v26  ;;  %v1072_v56 = vadd.f32 %v4132_v13, %v4131_v5  ;;  %v1319_v42 = vmul.f32 %v1255_v4, %v807_v25  ;;  %v4135_v25 = vld [vmem:[#allocation26_spill] sm:$0xff] }
 0x227   : > { %v2454_v61 = vpop.eup %2453  ;;  %v1323_v31 = vmul.f32 %v1259_v45, %v811_v41  ;;  %v1252_v24 = vadd.f32 1.0, %v2452_v47  ;;  %v1132_v57 = vmul.f32 0.7978845, %v1068_v32  ;;  %v810_v39 = vmul.f32 0.5, %v4129_v35  ;;  %v4136_v41 = vld [vmem:[#allocation24_spill] sm:$0xff] }
 0x228   : > { %v2456_v59 = vpop.eup %2455  ;;  %1707 = vmatprep.mubr.bf16.mxu0 %v1361_v53  ;;  %v1256_v12 = vadd.f32 1.0, %v2454_v61  ;;  %v1136_v37 = vmul.f32 0.7978845, %v1072_v56  ;;  %v1070_v21 = vadd.f32 %v4134_v36, %v4133_v15  ;;  %v1074_v54 = vadd.f32 %v4136_v41, %v4135_v25 }
 0x229   : > { %v2458_v33 = vpop.eup %2457  ;;  %v1363_v55 = vpack.c.bf16 %v1323_v31, %v1319_v42  ;;  %v1316_v58 = vmul.f32 %v1252_v24, %v804_v18  ;;  %v1254_v46 = vadd.f32 1.0, %v2456_v59  ;;  %2467 = vtanh.f32 %v1132_v57 }
 0x22a   : > { %v1320_v30 = vmul.f32 %v1256_v12, %v808_v1  ;;  %v1258_v7 = vadd.f32 1.0, %v2458_v33  ;;  %2469 = vtanh.f32 %v1136_v37  ;;  %v1019_v60 = vmul.f32 %v3733_v16, %v3707_v34 }
 0x22b   : > { %1804 = vmatprep.mubr.bf16.mxu1 %v1363_v55  ;;  %v1318_v35 = vmul.f32 %v1254_v46, %v806_v22  ;;  %v813_v51 = vmul.f32 0.5, %v3519_v40  ;;  %v1134_v2 = vmul.f32 0.7978845, %v1070_v21  ;;  %v1138_v49 = vmul.f32 0.7978845, %v1074_v54 }
 0x22c   : > { %v1360_v9 = vpack.c.bf16 %v1320_v30, %v1316_v58  ;;  %v1322_v3 = vmul.f32 %v1258_v7, %v810_v39  ;;  %v1077_v27 = vadd.f32 %v3678_v20, %v3622_v63  ;;  %v817_v28 = vmul.f32 0.5, %v3592_v62 }
 0x22d   : > { %v2460_v18 = vpop.eup %2459  ;;  %v815_v43 = vmul.f32 0.5, %v3526_v50  ;;  %2471 = vtanh.f32 %v1134_v2  ;;  %v1081_v16 = vadd.f32 %v3736_v29, %v3697_v38  ;;  %v1079_v20 = vadd.f32 %v3682_v11, %v3632_v48 }
 0x22e   : > { %v2462_v17 = vpop.eup %2461  ;;  %1708 = vmatmul.mubr.bf16.gmra.mrb[52].mxu0 %v1360_v9  ;;  %v1362_v4 = vpack.c.bf16 %v1322_v3, %v1318_v35  ;;  %v1261_v40 = vadd.f32 1.0, %v2460_v18  ;;  %2473 = vtanh.f32 %v1138_v49  ;;  %v1141_v26 = vmul.f32 0.7978845, %v1077_v27 }
 0x22f   : > { %v2464_v45 = vpop.eup %2463  ;;  %v1265_v1 = vadd.f32 1.0, %v2462_v17  ;;  %v1145_v32 = vmul.f32 0.7978845, %v1081_v16  ;;  %v1083_v62 = vadd.f32 %v1019_v60, %v3707_v34  ;;  %v819_v53 = vmul.f32 0.5, %v3596_v19 }
 0x230   : > { %v2466_v47 = vpop.eup %2465  ;;  %1805 = vmatmul.mubr.bf16.gmra.mrb[52].mxu1 %v1362_v4  ;;  %v1325_v50 = vmul.f32 %v1261_v40, %v813_v51  ;;  %v1263_v29 = vadd.f32 1.0, %v2464_v45  ;;  %2475 = vtanh.f32 %v1141_v26  ;;  %v1143_v56 = vmul.f32 0.7978845, %v1079_v20 }
 0x231   : > { %v1329_v22 = vmul.f32 %v1265_v1, %v817_v28  ;;  %v1267_v13 = vadd.f32 1.0, %v2466_v47  ;;  %2477 = vtanh.f32 %v1145_v32  ;;  %v1018_v61 = vmul.f32 %v3714_v44, %v3673_v52 }
 0x232   : > { %v1327_v42 = vmul.f32 %v1263_v29, %v815_v43  ;;  %v1147_v31 = vmul.f32 0.7978845, %v1083_v62  ;;  %v1076_v11 = vadd.f32 %v3657_v23, %v3602_v0  ;;  %2479 = vtanh.f32 %v1143_v56  ;;  %v4137_v23 = vld [vmem:[#allocation38_spill] sm:$0xff] }
 0x233   : > { %v2468_v24 = vpop.eup %2467  ;;  %v1365_v57 = vpack.c.bf16 %v1329_v22, %v1325_v50  ;;  %v1331_v59 = vmul.f32 %v1267_v13, %v819_v53  ;;  %v1080_v19 = vadd.f32 %v3710_v6, %v3654_v14  ;;  %v812_v39 = vmul.f32 0.5, %v3505_v10 }
 0x234   : > { %v2470_v12 = vpop.eup %2469  ;;  %v1260_v37 = vadd.f32 1.0, %v2468_v24  ;;  %2481 = vtanh.f32 %v1147_v31  ;;  %v1140_v36 = vmul.f32 0.7978845, %v1076_v11  ;;  %v816_v21 = vmul.f32 0.5, %v4131_v5 }
 0x235   : > { %1715 = vmatprep.mubr.bf16.mxu0 %v1365_v57  ;;  %v1367_v44 = vpack.c.bf16 %v1331_v59, %v1327_v42  ;;  %v1264_v33 = vadd.f32 1.0, %v2470_v12  ;;  %v1144_v55 = vmul.f32 0.7978845, %v1080_v19  ;;  %v1078_v58 = vadd.f32 %v4137_v23, %v3606_v8  ;;  %v3820_v12 = vld [vmem:[#allocation10] ss:$0 sm:$0xff] }
 0x236   : > { %2483 = vtanh.f32 %v1140_v36  ;;  %v1082_v46 = vadd.f32 %v1018_v61, %v3673_v52  ;;  %v1324_v6 = vmul.f32 %v1260_v37, %v812_v39  ;;  %v814_v5 = vmul.f32 0.5, %v4133_v15 }
 0x237   : > { %v2472_v30 = vpop.eup %2471  ;;  %1812 = vmatprep.mubr.bf16.mxu1 %v1367_v44  ;;  %v1328_v7 = vmul.f32 %v1264_v33, %v816_v21  ;;  %2485 = vtanh.f32 %v1144_v55  ;;  %v1142_v54 = vmul.f32 0.7978845, %v1078_v58  ;;  %v818_v51 = vmul.f32 0.5, %v4135_v25 }
 0x238   : > { %v2474_v10 = vpop.eup %2473  ;;  %v1262_v41 = vadd.f32 1.0, %v2472_v30  ;;  %v1146_v60 = vmul.f32 0.7978845, %v1082_v46  ;;  %v821_v28 = vmul.f32 0.5, %v3622_v63  ;;  %v825_v43 = vmul.f32 0.5, %v3697_v38 }
 0x239   : > { %v1364_v35 = vpack.c.bf16 %v1328_v7, %v1324_v6  ;;  %v1266_v2 = vadd.f32 1.0, %v2474_v10  ;;  %2487 = vtanh.f32 %v1142_v54  ;;  %v823_v45 = vmul.f32 0.5, %v3632_v48 }
 0x23a   : > { %v2476_v9 = vpop.eup %2475  ;;  %v1326_v49 = vmul.f32 %v1262_v41, %v814_v5  ;;  %2489 = vtanh.f32 %v1146_v60  ;;  %v827_v1 = vmul.f32 0.5, %v3707_v34  ;;  %v820_v38 = vmul.f32 0.5, %v3602_v0 }
 0x23b   : > { %v2478_v3 = vpop.eup %2477  ;;  %1716 = vmatmul.mubr.bf16.gmra.mrb[56].mxu0 %v1364_v35  ;;  %v1330_v27 = vmul.f32 %v1266_v2, %v818_v51  ;;  %v1269_v18 = vadd.f32 1.0, %v2476_v9  ;;  %v824_v29 = vmul.f32 0.5, %v3654_v14  ;;  %v822_v11 = vmul.f32 0.5, %v3606_v8 }
 0x23c   : > { %v1273_v16 = vadd.f32 1.0, %v2478_v3  ;;  %v2480_v17 = vpop.eup %2479  ;;  %v826_v24 = vmul.f32 0.5, %v3673_v52 }
 0x23d   : > { %v1366_v4 = vpack.c.bf16 %v1330_v27, %v1326_v49  ;;  %v1333_v15 = vmul.f32 %v1269_v18, %v821_v28  ;;  %v1271_v25 = vadd.f32 1.0, %v2480_v17 }
 0x23e   : > { %v2482_v40 = vpop.eup %2481  ;;  %v1337_v26 = vmul.f32 %v1273_v16, %v825_v43 }
 0x23f   : > { %1813 = vmatmul.mubr.bf16.gmra.mrb[56].mxu1 %v1366_v4  ;;  %v1275_v32 = vadd.f32 1.0, %v2482_v40  ;;  %v1335_v50 = vmul.f32 %v1271_v25, %v823_v45 }
 0x240   : > { %v2484_v20 = vpop.eup %2483  ;;  %v1369_v62 = vpack.c.bf16 %v1337_v26, %v1333_v15 }
 0x241   : > { %v2486_v47 = vpop.eup %2485  ;;  %v1339_v63 = vmul.f32 %v1275_v32, %v827_v1  ;;  %v1268_v53 = vadd.f32 1.0, %v2484_v20 }
 0x242   : > { %1723 = vmatprep.mubr.bf16.mxu0 %v1369_v62  ;;  %v1272_v22 = vadd.f32 1.0, %v2486_v47 }
 0x243   : > { %v1371_v13 = vpack.c.bf16 %v1339_v63, %v1335_v50  ;;  %v2488_v56 = vpop.eup %2487  ;;  %v1332_v61 = vmul.f32 %v1268_v53, %v820_v38 }
 0x244   : > { %v1336_v42 = vmul.f32 %v1272_v22, %v824_v29  ;;  %v2490_v48 = vpop.eup %2489  ;;  %v1270_v34 = vadd.f32 1.0, %v2488_v56 }
 0x245   : > { %1820 = vmatprep.mubr.bf16.mxu1 %v1371_v13  ;;  %v1274_v57 = vadd.f32 1.0, %v2490_v48 }
 0x246   : > { %v1368_v31 = vpack.c.bf16 %v1336_v42, %v1332_v61  ;;  %v1334_v59 = vmul.f32 %v1270_v34, %v822_v11 }
 0x247   : > { %v1338_v19 = vmul.f32 %v1274_v57, %v826_v24 }
 0x248   : > { %1724 = vmatmul.mubr.bf16.gmra.mrb[60].mxu0 %v1368_v31 }
 0x249   : > { %v1370_v0 = vpack.c.bf16 %v1338_v19, %v1334_v59 }
 0x24b   : > { %1821 = vmatmul.mubr.bf16.gmra.mrb[60].mxu1 %v1370_v0 }
 0x2a8   : > { %v2075_v14 = vpop.f32.mrb[32].mxu0 }
 0x2a9   : > { %v2076_v39 = vpop.f32.mrb[33].mxu0 }
 0x2aa   : > { %v2077_v36 = vadd.f32 %v2076_v39, %v2075_v14  ;;  %v2078_v44 = vpop.f32.mrb[34].mxu0 }
 0x2ab   : > { %v2139_v37 = vpop.f32.mrb[32].mxu1  ;;  %v2079_v33 = vpop.f32.mrb[35].mxu0 }
 0x2ac   : > { %v2140_v21 = vpop.f32.mrb[33].mxu1  ;;  %v1670_v8 = vadd.f32 %v2077_v36, %v3820_v12  ;;  %v2080_v23 = vadd.f32 %v2079_v33, %v2078_v44 }
 0x2ad   : > { %v2141_v55 = vadd.f32 %v2140_v21, %v2139_v37  ;;  %v2142_v52 = vpop.f32.mrb[34].mxu1 }
 0x2ae   : > { %v2143_v58 = vpop.f32.mrb[35].mxu1  ;;  %v1673_v30 = vadd.f32 %v2080_v23, %v3820_v12 }
 0x2af   : > { %v1767_v46 = vadd.f32 %v2141_v55, %v1670_v8  ;;  %v2144_v6 = vadd.f32 %v2143_v58, %v2142_v52 }
 0x2b1   : > { %1829 = vst [vmem:[%s3826_s24] sm:$0xff] %v1767_v46  ;;  %v1770_v7 = vadd.f32 %v2144_v6, %v1673_v30 }
 0x2b3   : > { %1830 = vst [vmem:[%s3826_s24 + $0x8] sm:$0xff] %v1770_v7 }
 0x2bd   : > { %v2081_v10 = vpop.f32.mrb[36].mxu0 }
 0x2be   : > { %v2082_v41 = vpop.f32.mrb[37].mxu0 }
 0x2bf   : > { %v2083_v54 = vadd.f32 %v2082_v41, %v2081_v10  ;;  %v2084_v60 = vpop.f32.mrb[38].mxu0 }
 0x2c0   : > { %v2145_v35 = vpop.f32.mrb[36].mxu1  ;;  %v2085_v5 = vpop.f32.mrb[39].mxu0 }
 0x2c1   : > { %v1678_v51 = vadd.f32 %v2083_v54, %v3820_v12  ;;  %v2146_v2 = vpop.f32.mrb[37].mxu1  ;;  %v2086_v9 = vadd.f32 %v2085_v5, %v2084_v60 }
 0x2c2   : > { %v2147_v3 = vadd.f32 %v2146_v2, %v2145_v35  ;;  %v2148_v49 = vpop.f32.mrb[38].mxu1 }
 0x2c3   : > { %v1681_v27 = vadd.f32 %v2086_v9, %v3820_v12  ;;  %v2149_v18 = vpop.f32.mrb[39].mxu1 }
 0x2c4   : > { %v1775_v28 = vadd.f32 %v2147_v3, %v1678_v51  ;;  %v2150_v43 = vadd.f32 %v2149_v18, %v2148_v49 }
 0x2c6   : > { %1831 = vst [vmem:[%s3826_s24 + $0x10] sm:$0xff] %v1775_v28  ;;  %v1778_v16 = vadd.f32 %v2150_v43, %v1681_v27 }
 0x2c8   : > { %1832 = vst [vmem:[%s3826_s24 + $0x18] sm:$0xff] %v1778_v16 }
 0x2d3   : > { %v2087_v17 = vpop.f32.mrb[40].mxu0 }
 0x2d4   : > { %v2088_v4 = vpop.f32.mrb[41].mxu0 }
 0x2d5   : > { %v2151_v40 = vpop.f32.mrb[40].mxu1  ;;  %v2089_v15 = vadd.f32 %v2088_v4, %v2087_v17  ;;  %v2090_v26 = vpop.f32.mrb[42].mxu0 }
 0x2d6   : > { %v2152_v25 = vpop.f32.mrb[41].mxu1  ;;  %v2091_v45 = vpop.f32.mrb[43].mxu0 }
 0x2d7   : > { %v1686_v1 = vadd.f32 %v2089_v15, %v3820_v12  ;;  %v2153_v32 = vadd.f32 %v2152_v25, %v2151_v40  ;;  %v2154_v20 = vpop.f32.mrb[42].mxu1  ;;  %v2092_v62 = vadd.f32 %v2091_v45, %v2090_v26 }
 0x2d8   : > { %v2155_v47 = vpop.f32.mrb[43].mxu1 }
 0x2d9   : > { %v1783_v50 = vadd.f32 %v2153_v32, %v1686_v1  ;;  %v1689_v63 = vadd.f32 %v2092_v62, %v3820_v12  ;;  %v2156_v53 = vadd.f32 %v2155_v47, %v2154_v20 }
 0x2db   : > { %1833 = vst [vmem:[%s3826_s24 + $0x20] sm:$0xff] %v1783_v50  ;;  %v1786_v38 = vadd.f32 %v2156_v53, %v1689_v63 }
 0x2dd   : > { %1834 = vst [vmem:[%s3826_s24 + $0x28] sm:$0xff] %v1786_v38 }
 0x2e8   : > { %v2093_v29 = vpop.f32.mrb[44].mxu0 }
 0x2e9   : > { %v2094_v22 = vpop.f32.mrb[45].mxu0 }
 0x2ea   : > { %v2157_v13 = vpop.f32.mrb[44].mxu1  ;;  %v2095_v56 = vadd.f32 %v2094_v22, %v2093_v29  ;;  %v2096_v61 = vpop.f32.mrb[46].mxu0 }
 0x2eb   : > { %v2158_v42 = vpop.f32.mrb[45].mxu1  ;;  %v2097_v48 = vpop.f32.mrb[47].mxu0 }
 0x2ec   : > { %v1694_v34 = vadd.f32 %v2095_v56, %v3820_v12  ;;  %v2159_v31 = vadd.f32 %v2158_v42, %v2157_v13  ;;  %v2160_v11 = vpop.f32.mrb[46].mxu1  ;;  %v2098_v24 = vadd.f32 %v2097_v48, %v2096_v61 }
 0x2ed   : > { %v2161_v57 = vpop.f32.mrb[47].mxu1 }
 0x2ee   : > { %v1791_v59 = vadd.f32 %v2159_v31, %v1694_v34  ;;  %v1697_v19 = vadd.f32 %v2098_v24, %v3820_v12  ;;  %v2162_v0 = vadd.f32 %v2161_v57, %v2160_v11 }
 0x2f0   : > { %1835 = vst [vmem:[%s3826_s24 + $0x30] sm:$0xff] %v1791_v59  ;;  %v1794_v14 = vadd.f32 %v2162_v0, %v1697_v19 }
 0x2f2   : > { %1836 = vst [vmem:[%s3826_s24 + $0x38] sm:$0xff] %v1794_v14 }
 0x2f5   : > { %v2099_v39 = vpop.f32.mrb[48].mxu0 }
 0x2f6   : > { %v2100_v37 = vpop.f32.mrb[49].mxu0 }
 0x2f7   : > { %v2163_v36 = vpop.f32.mrb[48].mxu1  ;;  %v2101_v44 = vadd.f32 %v2100_v37, %v2099_v39  ;;  %v2102_v21 = vpop.f32.mrb[50].mxu0 }
 0x2f8   : > { %v2164_v33 = vpop.f32.mrb[49].mxu1  ;;  %v2103_v8 = vpop.f32.mrb[51].mxu0 }
 0x2f9   : > { %v1702_v55 = vadd.f32 %v2101_v44, %v3820_v12  ;;  %v2165_v52 = vadd.f32 %v2164_v33, %v2163_v36  ;;  %v2166_v23 = vpop.f32.mrb[50].mxu1  ;;  %v2104_v58 = vadd.f32 %v2103_v8, %v2102_v21 }
 0x2fa   : > { %v2167_v46 = vpop.f32.mrb[51].mxu1 }
 0x2fb   : > { %v1799_v30 = vadd.f32 %v2165_v52, %v1702_v55  ;;  %v1705_v6 = vadd.f32 %v2104_v58, %v3820_v12  ;;  %v2168_v7 = vadd.f32 %v2167_v46, %v2166_v23 }
 0x2fd   : > { %1837 = vst [vmem:[%s3826_s24 + $0x40] sm:$0xff] %v1799_v30  ;;  %v1802_v10 = vadd.f32 %v2168_v7, %v1705_v6 }
 0x2ff   : > { %1838 = vst [vmem:[%s3826_s24 + $0x48] sm:$0xff] %v1802_v10 }
 0x301   : > { %v2105_v41 = vpop.f32.mrb[52].mxu0 }
 0x302   : > { %v2106_v54 = vpop.f32.mrb[53].mxu0 }
 0x303   : > { %v2169_v60 = vpop.f32.mrb[52].mxu1  ;;  %v2107_v35 = vadd.f32 %v2106_v54, %v2105_v41  ;;  %v2108_v5 = vpop.f32.mrb[54].mxu0 }
 0x304   : > { %v2170_v51 = vpop.f32.mrb[53].mxu1  ;;  %v2109_v2 = vpop.f32.mrb[55].mxu0 }
 0x305   : > { %v1710_v9 = vadd.f32 %v2107_v35, %v3820_v12  ;;  %v2171_v3 = vadd.f32 %v2170_v51, %v2169_v60  ;;  %v2172_v49 = vpop.f32.mrb[54].mxu1  ;;  %v2110_v27 = vadd.f32 %v2109_v2, %v2108_v5 }
 0x306   : > { %v2173_v18 = vpop.f32.mrb[55].mxu1 }
 0x307   : > { %v1807_v28 = vadd.f32 %v2171_v3, %v1710_v9  ;;  %v1713_v43 = vadd.f32 %v2110_v27, %v3820_v12  ;;  %v2174_v16 = vadd.f32 %v2173_v18, %v2172_v49 }
 0x309   : > { %1839 = vst [vmem:[%s3826_s24 + $0x50] sm:$0xff] %v1807_v28  ;;  %v1810_v17 = vadd.f32 %v2174_v16, %v1713_v43 }
 0x30b   : > { %1840 = vst [vmem:[%s3826_s24 + $0x58] sm:$0xff] %v1810_v17 }
 0x30e   : > { %v2111_v4 = vpop.f32.mrb[56].mxu0 }
 0x30f   : > { %v2112_v40 = vpop.f32.mrb[57].mxu0 }
 0x310   : > { %v2113_v15 = vadd.f32 %v2112_v40, %v2111_v4  ;;  %v2114_v26 = vpop.f32.mrb[58].mxu0 }
 0x311   : > { %v2115_v25 = vpop.f32.mrb[59].mxu0 }
 0x312   : > { %v2175_v45 = vpop.f32.mrb[56].mxu1  ;;  %v1718_v1 = vadd.f32 %v2113_v15, %v3820_v12  ;;  %v2116_v32 = vadd.f32 %v2115_v25, %v2114_v26 }
 0x313   : > { %v2176_v20 = vpop.f32.mrb[57].mxu1 }
 0x314   : > { %v2177_v62 = vadd.f32 %v2176_v20, %v2175_v45  ;;  %v2178_v47 = vpop.f32.mrb[58].mxu1  ;;  %v1721_v50 = vadd.f32 %v2116_v32, %v3820_v12 }
 0x315   : > { %v2179_v63 = vpop.f32.mrb[59].mxu1 }
 0x316   : > { %v1815_v53 = vadd.f32 %v2177_v62, %v1718_v1  ;;  %v2180_v38 = vadd.f32 %v2179_v63, %v2178_v47 }
 0x318   : > { %1841 = vst [vmem:[%s3826_s24 + $0x60] sm:$0xff] %v1815_v53  ;;  %v1818_v29 = vadd.f32 %v2180_v38, %v1721_v50 }
 0x31a   : > { %1842 = vst [vmem:[%s3826_s24 + $0x68] sm:$0xff] %v1818_v29 }
 0x31b   : > { %v2117_v22 = vpop.f32.mrb[60].mxu0 }
 0x31c   : > { %v2118_v13 = vpop.f32.mrb[61].mxu0 }
 0x31d   : > { %v2119_v56 = vadd.f32 %v2118_v13, %v2117_v22  ;;  %v2120_v61 = vpop.f32.mrb[62].mxu0 }
 0x31e   : > { %v2121_v42 = vpop.f32.mrb[63].mxu0  ;;  %v2181_v48 = vpop.f32.mrb[60].mxu1 }
 0x31f   : > { %v1726_v34 = vadd.f32 %v2119_v56, %v3820_v12  ;;  %v2122_v31 = vadd.f32 %v2121_v42, %v2120_v61  ;;  %v2182_v11 = vpop.f32.mrb[61].mxu1 }
 0x320   : > { %v2183_v24 = vadd.f32 %v2182_v11, %v2181_v48  ;;  %v2184_v57 = vpop.f32.mrb[62].mxu1 }
 0x321   : > { %v1729_v59 = vadd.f32 %v2122_v31, %v3820_v12  ;;  %v2185_v19 = vpop.f32.mrb[63].mxu1 }
 0x322   : > { %v1823_v0 = vadd.f32 %v2183_v24, %v1726_v34  ;;  %v2186_v14 = vadd.f32 %v2185_v19, %v2184_v57 }
 0x324   : > { %1843 = vst [vmem:[%s3826_s24 + $0x70] sm:$0xff] %v1823_v0  ;;  %v1826_v39 = vadd.f32 %v2186_v14, %v1729_v59 }
 0x326   : > { %1844 = vst [vmem:[%s3826_s24 + $0x78] sm:$0xff] %v1826_v39 }
 0x327   : > { %2646 = shalt.err (!%p2643_p13)
}
 0x328   : > { %s2647_s28 = scalar_lea.hbm %s3861_s13, 2048  ;;  %s2651_s23 = scalar_lea.hbm %s3914_s5, 4096 }
 0x329   : > { %p2648_p9 = scmp.ne.s32.totalorder %s3861_s13, %s2647_s28  ;;  %p2652_p6 = scmp.lt.u32.totalorder %s3861_s13, %s3914_s5 }
 0x32a   : > { %p2653_p10 = scmp.lt.u32.totalorder %s2651_s23, %s2647_s28  ;;  %p2655_p4 = scmp.lt.u32.totalorder %s2647_s28, %s3861_s13 }
 0x32b   : > { %p2649_p0 = pnand %p2648_p9, %p2921_p8 }
 0x32c   : > { %p2654_p3 = por %p2653_p10, %p2652_p6 }
 0x32d   : > { %p2650_p11 = pneg %p2649_p0 }
 0x32e   : > { %p2656_p5 = por %p2655_p4, %p2654_p3 }
 0x330   : > { %p2657_p7 = pnand %p2656_p5, %p2650_p11 }
 0x332   : > { %2660 = shalt.err (!%p2657_p7)
}
 0x333   : > { %s2722_s26 = smov 128   ;;  %s2723_s11 = smov 8  }
 0x334   : > { %2205 = dma.vmem_to_hbm [thread:$0]  (%p2921_p8), %s3863_s9, 2048, %s3861_s13, %s1846_s17, %s2722_s26, %s2722_s26, %s2723_s11  }
 0x335 PF: > { %s1874_s27 = sand.u32 1, %s2695_s18   ;;  %p4138_p12 = scmp.ne.s32.totalorder %s3981_s25, 0 }
 0x336   : > { %p4139_p2 = scmp.ge.s32.totalorder %s2707_s21, 2  ;;  %s1875_s30 = scalar_lea.sflag [#allocation4], %s1874_s27 }
 0x338   : > { %p2225_p1 = pnand %p4139_p2, %p4138_p12 }
 0x33a   : > { %2690 = dma.done.wait (!%p2225_p1), %s1875_s30, 2048  }
 0x33b   : > { %2692 = vsyncadd (!%p2225_p1), %s1875_s30, 4294965248  ;;  %p20_p13 = scmp.ge.s32.totalorder %s2908_s12, 4   ;;  %s4140_s18 = smov %s2699_s19 }
 0x33c   : > { %s4141_s19 = smov %s2703_s20  ;;  %s4142_s20 = smov %s2917_s15 }
 0x33d   : > { %s4143_s21 = smov %s2908_s12  ;;  %22 = sbr.rel (!%p20_p13) target bundleno = 7 (0x7), region = 101 }
 0x344   :  { %1880 = vsyncpa [#allocation3], 1 }
 0x345   :  { %1882 = vsyncpa [#allocation3 + $0x1], 1 }
 0x346   :  { %1883 = vsyncpa [#allocation6], 1 }
 0x347   :  { %1884 = vsyncpa [#allocation9], 1 }
 0x348   :  { %1885 = vsyncpa [#allocation4], 1 }
 0x349   :  { %1887 = vsyncpa [#allocation4 + $0x1], 1 }

</bundles_post_ra>
